<compile_context>
chip_gen: v7x
topology: tpu7x:2x2x1
jax: 0.10.0
libtpu: 0.0.40
codegen_flags: <defaults>
</compile_context>

<pallas_src>
import math

import jax
import jax.numpy as jnp
from jax import lax
from jax.experimental import pallas as pl
from jax.experimental.pallas import tpu as pltpu


# ----------------------------- helpers --------------------------------------

def _choose_tile(dim, candidates):
    """Largest candidate tile (checked in descending order) dividing `dim`."""
    for c in sorted(candidates, reverse=True):
        if dim % c == 0:
            return c
    return dim


# ----------------------------- linear kernel --------------------------------

def _linear_kernel(x_ref, w_ref, b_ref, o_ref, acc_ref):
    # x: (tm, tk), w: (tk, tn), b: (1, tn) -> o: (tm, tn); acc: (tm, tn) f32.
    k = pl.program_id(2)

    @pl.when(k == 0)
    def _init():
        acc_ref[...] = jnp.zeros_like(acc_ref)

    # bf16 MXU inputs, f32 accumulation.
    acc_ref[...] += jnp.dot(x_ref[...].astype(jnp.bfloat16),
                            w_ref[...].astype(jnp.bfloat16),
                            preferred_element_type=jnp.float32)

    @pl.when(k == pl.num_programs(2) - 1)
    def _finalize():
        o_ref[...] = (acc_ref[...] + b_ref[...]).astype(o_ref.dtype)


def pallas_linear(x2d, w, b):
    """x2d: (M, K) @ w: (K, N) + b: (N,) -> (M, N)."""
    M, K = x2d.shape
    N = w.shape[1]
    # Descending candidates: pick the biggest dividing tile (fewer grid steps,
    # fewer re-fetches of the non-resident operand).  tm maximized so weight
    # tiles are re-fetched as few times as possible.
    tm = _choose_tile(M, (512, 256, 128, 64, 32, 16, 8))
    tn = _choose_tile(N, (512, 384, 256, 128))
    tk = _choose_tile(K, (512, 256, 128))
    grid = (M // tm, N // tn, K // tk)
    return pl.pallas_call(
        _linear_kernel,
        out_shape=jax.ShapeDtypeStruct((M, N), x2d.dtype),
        grid=grid,
        in_specs=[
            pl.BlockSpec((tm, tk), lambda i, j, k: (i, k)),   # activations
            pl.BlockSpec((tk, tn), lambda i, j, k: (k, j)),   # weights
            pl.BlockSpec((1, tn), lambda i, j, k: (0, j)),    # bias
        ],
        out_specs=pl.BlockSpec((tm, tn), lambda i, j, k: (i, j)),
        scratch_shapes=[pltpu.VMEM((tm, tn), jnp.float32)],
        compiler_params=pltpu.CompilerParams(
            dimension_semantics=("parallel", "parallel", "arbitrary"),
            vmem_limit_bytes=64 * 1024 * 1024),
    )(x2d, w, b.reshape(1, N))


# --------------------------- flash attention kernel --------------------------

def _flash_attn_kernel(q_ref, k_ref, v_ref, o_ref, m_sc, l_sc, acc_sc):
    # q_ref: (1, tq, D), k_ref/v_ref: (1, tk, D), o_ref: (1, tq, D)
    # Scratch: m_sc/l_sc: (tq, 1) f32, acc_sc: (tq, D) f32.
    tq = q_ref.shape[1]
    tk = k_ref.shape[1]
    qi = pl.program_id(2)
    ki = pl.program_id(3)
    nk = pl.num_programs(3)
    q_start = qi * tq
    k_start = ki * tk

    @pl.when(ki == 0)
    def _init():
        m_sc[...] = jnp.full_like(m_sc, -1e30)
        l_sc[...] = jnp.zeros_like(l_sc)
        acc_sc[...] = jnp.zeros_like(acc_sc)

    def _update(apply_mask):
        # 1/sqrt(D) is already folded into the q columns of w_attn/b_attn.
        q = q_ref[0].astype(jnp.bfloat16)
        k = k_ref[0].astype(jnp.bfloat16)
        v = v_ref[0].astype(jnp.bfloat16)

        # q @ k^T contracting on D (no k.T materialization), f32 logits.
        s = lax.dot_general(q, k, (((1,), (1,)), ((), ())),
                            preferred_element_type=jnp.float32)   # (tq, tk)

        if apply_mask:  # only built for blocks intersecting the diagonal
            row = q_start + lax.broadcasted_iota(jnp.int32, (tq, tk), 0)
            col = k_start + lax.broadcasted_iota(jnp.int32, (tq, tk), 1)
            s = jnp.where(col <= row, s, -1e30)

        # online-softmax update (f32)
        m_prev = m_sc[...]
        m_new = jnp.maximum(m_prev, jnp.max(s, axis=-1, keepdims=True))
        alpha = jnp.exp(m_prev - m_new)
        p = jnp.exp(s - m_new)
        l_sc[...] = alpha * l_sc[...] + jnp.sum(p, axis=-1, keepdims=True)
        acc_sc[...] = alpha * acc_sc[...] + jnp.dot(
            p.astype(jnp.bfloat16), v, preferred_element_type=jnp.float32)
        m_sc[...] = m_new

    # Block fully at/below the causal diagonal: no mask needed.
    fully_below = k_start + tk - 1 <= q_start
    # Block intersecting the diagonal: masked path.
    on_diag = jnp.logical_and(k_start <= q_start + tq - 1,
                              jnp.logical_not(fully_below))
    # Blocks fully above the diagonal hit neither branch (compute skipped);
    # their K/V DMAs were already deduped by the clamped index maps.

    @pl.when(fully_below)
    def _unmasked():
        _update(apply_mask=False)

    @pl.when(on_diag)
    def _masked():
        _update(apply_mask=True)

    @pl.when(ki == nk - 1)
    def _finalize():
        inv_l = pl.reciprocal(l_sc[...], approx=True)     # EUP slot
        o_ref[0] = (acc_sc[...] * inv_l).astype(o_ref.dtype)


def pallas_causal_attention_qkv(qkv, n_head, *, tq=256, tk=256):
    """Causal attention directly from the fused qkv activation.

    qkv: (B, T, 3C) -> (B, T, C); output already in the post-transpose
    (B, T, C) layout expected by c_proj (no split / transpose ops needed).
    """
    Bsz, T, C3 = qkv.shape
    C = C3 // 3
    H = n_head
    D = C // H

    tq = min(tq, T)
    tk = min(tk, T)
    assert T % tq == 0 and T % tk == 0, "seq len must be divisible by tiles"
    grid = (Bsz, H, T // tq, T // tk)

    def q_map(b, h, qi, ki):
        # q for head h lives in qkv columns [h*D, (h+1)*D)
        return (b, qi, h)

    def _kv_last(qi):
        # last kv block causally needed by query block qi
        return (qi * tq + tq - 1) // tk

    def k_map(b, h, qi, ki):
        # k for head h lives in qkv columns [C + h*D, ...); clamp ki so
        # above-diagonal steps repeat the previous block (DMA deduped).
        return (b, jnp.minimum(ki, _kv_last(qi)), H + h)

    def v_map(b, h, qi, ki):
        return (b, jnp.minimum(ki, _kv_last(qi)), 2 * H + h)

    return pl.pallas_call(
        _flash_attn_kernel,
        out_shape=jax.ShapeDtypeStruct((Bsz, T, C), qkv.dtype),
        grid=grid,
        in_specs=[
            pl.BlockSpec((1, tq, D), q_map),
            pl.BlockSpec((1, tk, D), k_map),
            pl.BlockSpec((1, tk, D), v_map),
        ],
        # write head h output straight into columns [h*D, (h+1)*D) of (B, T, C)
        out_specs=pl.BlockSpec((1, tq, D), q_map),
        scratch_shapes=[
            pltpu.VMEM((tq, 1), jnp.float32),   # running max m
            pltpu.VMEM((tq, 1), jnp.float32),   # running sum l
            pltpu.VMEM((tq, D), jnp.float32),   # output accumulator
        ],
        compiler_params=pltpu.CompilerParams(
            dimension_semantics=("parallel", "parallel", "parallel", "arbitrary"),
            vmem_limit_bytes=64 * 1024 * 1024),
    )(qkv, qkv, qkv)


# ------------------------------ module forward --------------------------------

def causal_self_attention(x, params, n_head):
    """Forward pass matching CausalSelfAttention.forward (no HBM transposes)."""
    Bsz, T, C = x.shape
    D = C // n_head
    scale = 1.0 / math.sqrt(D)

    # Fold 1/sqrt(D) into the q columns of c_attn (weights are tiny vs
    # activations), removing the per-kv-step q rescale from the kernel.
    w_attn = params["w_attn"].at[:, :C].multiply(scale)
    b_attn = params["b_attn"].at[:C].multiply(scale)

    # qkv = self.c_attn(x)
    qkv = pallas_linear(x.reshape(Bsz * T, C), w_attn, b_attn)
    qkv = qkv.reshape(Bsz, T, 3 * C)

    # split/view/transpose + scaled_dot_product_attention + transpose/view,
    # fused into one flash-attention kernel reading qkv in place.
    y = pallas_causal_attention_qkv(qkv, n_head)          # (B, T, C)

    # y = self.c_proj(y)
    y = pallas_linear(y.reshape(Bsz * T, C), params["w_proj"], params["b_proj"])
    return y.reshape(Bsz, T, C)


# -------------------------------- reference -----------------------------------

def reference(x, params, n_head):
    Bsz, T, C = x.shape
    D = C // n_head
    qkv = x @ params["w_attn"] + params["b_attn"]
    q, k, v = jnp.split(qkv, 3, axis=2)
    q = q.reshape(Bsz, T, n_head, D).transpose(0, 2, 1, 3)
    k = k.reshape(Bsz, T, n_head, D).transpose(0, 2, 1, 3)
    v = v.reshape(Bsz, T, n_head, D).transpose(0, 2, 1, 3)
    s = jnp.einsum("bhqd,bhkd->bhqk", q, k) / math.sqrt(D)
    mask = jnp.tril(jnp.ones((T, T), dtype=bool))
    s = jnp.where(mask, s, -1e30)
    p = jax.nn.softmax(s, axis=-1)
    y = jnp.einsum("bhqk,bhkd->bhqd", p, v)
    y = y.transpose(0, 2, 1, 3).reshape(Bsz, T, C)
    return y @ params["w_proj"] + params["b_proj"]


# ---------------------------------- main ---------------------------------------

if __name__ == "__main__":
    # Small but lane-dense config: n_embd % n_head == 0, head_dim = 128.
    Bsz, T, n_embd, n_head = 2, 256, 256, 2

    key = jax.random.PRNGKey(0)
    k_x, k_wa, k_ba, k_wp, k_bp = jax.random.split(key, 5)

    x = jax.random.normal(k_x, (Bsz, T, n_embd), dtype=jnp.float32)
    params = {
        # nn.Linear(n_embd, 3*n_embd): weight (3C, C) -> stored transposed (C, 3C)
        "w_attn": 0.02 * jax.random.normal(k_wa, (n_embd, 3 * n_embd), jnp.float32),
        "b_attn": 0.02 * jax.random.normal(k_ba, (3 * n_embd,), jnp.float32),
        # nn.Linear(n_embd, n_embd): stored transposed (C, C)
        "w_proj": 0.02 * jax.random.normal(k_wp, (n_embd, n_embd), jnp.float32),
        "b_proj": 0.02 * jax.random.normal(k_bp, (n_embd,), jnp.float32),
    }

    y = causal_self_attention(x, params, n_head)
    y = jax.block_until_ready(y)

    y_ref = reference(x, params, n_head)
    assert y.shape == (Bsz, T, n_embd)
    err = float(jnp.max(jnp.abs(y - y_ref)))
    # bf16 MXU inputs (f32 accumulation) vs the all-f32 reference -> loosen tol.
    assert jnp.allclose(y, y_ref, atol=1e-2, rtol=1e-2), f"mismatch vs reference: {err}"

    print("KERNEL_OK")
</pallas_src>

<mosaic_0001>
module attributes {stable_mosaic.version = 11 : i64} {
  func.func @_linear_kernel(%arg0: i32, %arg1: i32, %arg2: i32, %arg3: memref<512x256xf32, #tpu.memory_space<vmem>>, %arg4: memref<256x384xf32, #tpu.memory_space<vmem>>, %arg5: memref<1x384xf32, #tpu.memory_space<vmem>>, %arg6: memref<512x384xf32, #tpu.memory_space<vmem>>, %arg7: memref<512x384xf32, #tpu.memory_space<vmem>>) attributes {dimension_semantics = [#tpu.dimension_semantics<parallel>, #tpu.dimension_semantics<parallel>, #tpu.dimension_semantics<arbitrary>], iteration_bounds = array<i64: 1, 2, 1>, scalar_prefetch = 0 : i64, scratch_operands = 1 : i64, tpu.core_type = #tpu.core_type<tc>, window_params = [{transform_indices = @transform_0, window_bounds = array<i64: 512, 256>}, {transform_indices = @transform_1, window_bounds = array<i64: 256, 384>}, {transform_indices = @transform_2, window_bounds = array<i64: 1, 384>}, {transform_indices = @transform_3, window_bounds = array<i64: 512, 384>}]} {
    %c0_i32 = arith.constant 0 : i32
    %0 = arith.cmpi eq, %arg2, %c0_i32 : i32
    %1 = arith.extui %0 : i1 to i32
    %c0_i32_0 = arith.constant 0 : i32
    %2 = arith.cmpi ne, %1, %c0_i32_0 : i32
    scf.if %2 {
      %cst_10 = arith.constant 0.000000e+00 : f32
      %14 = vector.broadcast %cst_10 : f32 to vector<512x384xf32>
      %c0_11 = arith.constant 0 : index
      %c0_12 = arith.constant 0 : index
      %15 = vector.load %arg7[%c0_11, %c0_12] : memref<512x384xf32, #tpu.memory_space<vmem>>, vector<512x384xf32>
      tpu.vector_store %arg7[%c0_11, %c0_12], %14 {strides = array<i32>} : memref<512x384xf32, #tpu.memory_space<vmem>>, vector<512x384xf32>,
    } else {
    }
    %c0 = arith.constant 0 : index
    %c0_1 = arith.constant 0 : index
    %3 = vector.load %arg7[%c0, %c0_1] : memref<512x384xf32, #tpu.memory_space<vmem>>, vector<512x384xf32>
    %c0_2 = arith.constant 0 : index
    %c0_3 = arith.constant 0 : index
    %4 = vector.load %arg3[%c0_2, %c0_3] : memref<512x256xf32, #tpu.memory_space<vmem>>, vector<512x256xf32>
    %5 = arith.truncf %4 : vector<512x256xf32> to vector<512x256xbf16>
    %c0_4 = arith.constant 0 : index
    %c0_5 = arith.constant 0 : index
    %6 = vector.load %arg4[%c0_4, %c0_5] : memref<256x384xf32, #tpu.memory_space<vmem>>, vector<256x384xf32>
    %7 = arith.truncf %6 : vector<256x384xf32> to vector<256x384xbf16>
    %cst = arith.constant dense<0.000000e+00> : vector<512x384xf32>
    %8 = tpu.matmul %5, %7, %cst {dimension_numbers = #tpu.dot_dimension_numbers<[1], [0], [0], [1], [0, 0, 1, 1], [], []>} : vector<512x256xbf16>, vector<256x384xbf16>, vector<512x384xf32> -> vector<512x384xf32>
    %9 = arith.addf %3, %8 : vector<512x384xf32>
    %c0_6 = arith.constant 0 : index
    %c0_7 = arith.constant 0 : index
    %10 = vector.load %arg7[%c0_6, %c0_7] : memref<512x384xf32, #tpu.memory_space<vmem>>, vector<512x384xf32>
    tpu.vector_store %arg7[%c0_6, %c0_7], %9 {strides = array<i32>} : memref<512x384xf32, #tpu.memory_space<vmem>>, vector<512x384xf32>,
    %c0_i32_8 = arith.constant 0 : i32
    %11 = arith.cmpi eq, %arg2, %c0_i32_8 : i32
    %12 = arith.extui %11 : i1 to i32
    %c0_i32_9 = arith.constant 0 : i32
    %13 = arith.cmpi ne, %12, %c0_i32_9 : i32
    scf.if %13 {
      %c0_10 = arith.constant 0 : index
      %c0_11 = arith.constant 0 : index
      %14 = vector.load %arg7[%c0_10, %c0_11] : memref<512x384xf32, #tpu.memory_space<vmem>>, vector<512x384xf32>
      %c0_12 = arith.constant 0 : index
      %c0_13 = arith.constant 0 : index
      %15 = vector.load %arg5[%c0_12, %c0_13] : memref<1x384xf32, #tpu.memory_space<vmem>>, vector<1x384xf32>
      %16 = vector.broadcast %15 : vector<1x384xf32> to vector<512x384xf32>
      %17 = arith.addf %14, %16 : vector<512x384xf32>
      %c0_14 = arith.constant 0 : index
      %c0_15 = arith.constant 0 : index
      %18 = vector.load %arg6[%c0_14, %c0_15] : memref<512x384xf32, #tpu.memory_space<vmem>>, vector<512x384xf32>
      tpu.vector_store %arg6[%c0_14, %c0_15], %17 {strides = array<i32>} : memref<512x384xf32, #tpu.memory_space<vmem>>, vector<512x384xf32>,
    } else {
    }
    return
  }
  func.func @transform_0(%arg0: i32, %arg1: i32, %arg2: i32) -> (i32, i32) {
    %c0_i32 = arith.constant 0 : i32
    return %arg0, %arg2 : i32, i32
  }
  func.func @transform_1(%arg0: i32, %arg1: i32, %arg2: i32) -> (i32, i32) {
    %c0_i32 = arith.constant 0 : i32
    return %arg2, %arg1 : i32, i32
  }
  func.func @transform_2(%arg0: i32, %arg1: i32, %arg2: i32) -> (i32, i32) {
    %c0_i32 = arith.constant 0 : i32
    %c0_i32_0 = arith.constant 0 : i32
    return %c0_i32, %arg1 : i32, i32
  }
  func.func @transform_3(%arg0: i32, %arg1: i32, %arg2: i32) -> (i32, i32) {
    %c0_i32 = arith.constant 0 : i32
    return %arg0, %arg1 : i32, i32
  }
}

</mosaic_0001>

<bundles_post_ra>
// kernel: tpu_custom_call.1
= control target key start
LH: loop header
LB: loop body
LE: loop exit
PB: predicated region body
PF: predicated region fallthrough
CT: control target
= control target key end

     0   :  { %s3858_s0 = inlined_call_operand.hbm [shape: f32[512,256], index: 0, kind: input, shape index: {}]   ;;  %s3859_s1 = inlined_call_operand.hbm [shape: f32[256,768], index: 1, kind: input, shape index: {}]   ;;  %s3860_s2 = inlined_call_operand.hbm [shape: f32[1,768], index: 2, kind: input, shape index: {}]   ;;  %s3861_s3 = inlined_call_operand.hbm [shape: f32[512,768], index: 3, kind: output, shape index: {}]  }
   0x1   :  { %3870 = sst [smem:[#allocation14_spill]] %s3859_s1 }
   0x2   :  { %8 = vsyncpa [#allocation4], 0 }
   0x3   :  { %9 = vsyncpa [#allocation7], 0 }
   0x4   :  { %11 = vsyncpa [#allocation7 + $0x1], 0 }
   0x5   :  { %12 = vsyncpa [#allocation5], 0 }
   0x6   :  { %14 = vsyncpa [#allocation5 + $0x1], 0  ;;  %s3092_s12 = smov 0   ;;  %s3094_s13 = smov 0  }
   0x7   :  { %s3096_s14 = smov 0   ;;  %s3098_s15 = smov 0  }
   0x8   :  { %s3100_s16 = smov 0   ;;  %s3102_s17 = smov 0  }
   0x9 LB: > { %s35_s18 = sadd.s32 1, %s3053_s16  ;;  %s76_s19 = sadd.s32 1, %s3045_s14  ;;  %s3057_s17 = sphi %s3102_s17, %s20_s17   ;;  %s3053_s16 = sphi %s3100_s16, %s3894_s16   ;;  %s3049_s15 = sphi %s3098_s15, %s3893_s15   ;;  %s3045_s14 = sphi %s3096_s14, %s3892_s14   ;;  %s3041_s13 = sphi %s3094_s13, %s3891_s13   ;;  %s3037_s12 = sphi %s3092_s12, %s3890_s12  }
   0xa   : > { %p37_p0 = scmp.ge.s32.totalorder %s35_s18, 2  ;;  %p83_p1 = scmp.ne.s32.totalorder %s3045_s14, %s3041_s13 }
   0xb   : > { %p84_p2 = scmp.eq.s32.totalorder %s3057_s17, 0  ;;  %p2822_p5 = scmp.lt.s32.totalorder %s3057_s17, 2 }
   0xc   : > { %s3896_s18 = smov (%p37_p0, %s35_s18), 0  ;;  %s186_s21 = sand.u32 1, %s3057_s17  }
   0xd   : > { %3871 = sst [smem:[#allocation13_spill]] %s3896_s18  ;;  %p85_p4 = por %p84_p2, %p83_p1 }
   0xe   : > { %s72_s20 = ssub.s32 %s3053_s16, %s3896_s18  ;;  %s188_s22 = sand.u32 1, %s3045_s14  }
   0xf   : > { %p74_p6 = scmp.eq.s32.totalorder %s72_s20, 0  ;;  %s2788_s23 = smul.u32 384, %s3053_s16 }
  0x10   : > { %s2791_s25 = smul.u32 768, %s188_s22  ;;  %s3872_s1 = sld [smem:[#allocation14_spill]] }
  0x11   : > { %s3140_s24 = scalar_select %p74_p6, %s3045_s14, %s76_s19  }
  0x12   : > { %p3149_p7 = pnand %p2822_p5, %p85_p4  ;;  %s190_s30 = scalar_lea.vmem [#allocation6], %s2791_s25 }
  0x13   : > { %s200_s4 = sshll.u32 %s190_s30, 4  ;;  %s3155_s5 = scalar_lea.sflag [#allocation7], %s186_s21  ;;  %s3153_s4 = int_to_ptr.vmem [resolvable:$true] %s200_s4 }
  0x14   : > { %s3873_s29 = scalar_select %p3149_p7, 1, 0 }
  0x15   : > { %p3864_p9 = pneg %p3149_p7 }
  0x16   : > { %s3147_s28 = scalar_lea.hbm %s3872_s1, %s2788_s23  ;;  %s2888_s9 = scalar_lea.hbm %s3872_s1, 24576 }
  0x17   : > { %s2883_s6 = scalar_lea.hbm %s3147_s28, 12288  ;;  %p2889_p12 = scmp.lt.u32.totalorder %s3147_s28, %s3872_s1 }
  0x18   : > { %p2884_p8 = scmp.ne.s32.totalorder %s3147_s28, %s2883_s6  ;;  %p2890_p13 = scmp.lt.u32.totalorder %s2888_s9, %s2883_s6 }
  0x19   : > { %p2892_p2 = scmp.lt.u32.totalorder %s2883_s6, %s3147_s28 }
  0x1a   : > { %p2886_p10 = pnand %p3864_p9, %p2884_p8  ;;  %p2891_p0 = por %p2890_p13, %p2889_p12 }
  0x1c   : > { %p2887_p11 = pneg %p2886_p10  ;;  %p2893_p4 = por %p2892_p2, %p2891_p0 }
  0x1e   : > { %p2894_p5 = pnand %p2893_p4, %p2887_p11 }
  0x20   : > { %2897 = shalt.err (!%p2894_p5)
}
  0x21   : > { %s2898_s19 = scalar_lea.vmem %s3153_s4, 12288  ;;  %s3059_s20 = smov [#allocation6]  }
  0x22   : > { %p2899_p6 = scmp.ne.s32.totalorder %s3153_s4, %s2898_s19  ;;  %s2903_s21 = sshll.u32 %s3059_s20, 4  ;;  %s2904_s21 = int_to_ptr.vmem [resolvable:$false] %s2903_s21 }
  0x23   : > { %s2905_s23 = scalar_lea.vmem %s2904_s21, 24576  ;;  %p2906_p3 = scmp.lt.s32.totalorder %s3153_s4, %s2904_s21 }
  0x24   : > { %p2901_p8 = pnand %p2899_p6, %p3864_p9  ;;  %p2907_p12 = scmp.lt.s32.totalorder %s2905_s23, %s2898_s19 }
  0x26   : > { %p2902_p10 = pneg %p2901_p8  ;;  %p2908_p13 = por %p2907_p12, %p2906_p3 }
  0x28   : > { %p2909_p0 = pnand %p2908_p13, %p2902_p10 }
  0x2a   : > { %2912 = shalt.err (!%p2909_p0)
}
  0x2b   : > { %s3060_s25 = smov 768   ;;  %s3061_s26 = smov 384  }
  0x2c   : > { %s3062_s27 = smov 24   ;;  %s3184_s30 = sadd.s32 4294967295, %s3057_s17  }
  0x2d   : > { %2813 = dma.hbm_to_vmem [thread:$0]  (!%p3149_p7), %s3147_s28, 12288, %s3153_s4, %s3155_s5, %s3060_s25, %s3061_s26, %s3062_s27  }
  0x2e   : > { %s2777_s6 = sadd.s32 4294967294, %s3057_s17   ;;  %p89_p3 = scmp.ne.s32.totalorder %s3041_s13, %s3037_s12 }
  0x2f   : > { %p3863_p11 = scmp.eq.s32.totalorder %s3184_s30, 0  ;;  %p141_p2 = scmp.eq.s32.totalorder %s3184_s30, 1 }
  0x30   : > { %p147_p4 = scmp.eq.s32.totalorder %s2777_s6, 1  ;;  %p2778_p6 = scmp.ge.s32.totalorder %s3057_s17, 1 }
  0x31   : > { %p3193_p5 = por %p3863_p11, %p89_p3  ;;  %p3201_p8 = por %p141_p2, %p83_p1 }
  0x32   : > { %p3205_p10 = por %p147_p4, %p89_p3  ;;  %p154_p12 = scmp.lt.s32.totalorder %s3057_s17, 3 }
  0x33   : > { %s3874_s7 = scalar_select %p3193_p5, 1, 0 }
  0x34   : > { %s3875_s28 = scalar_select %p3201_p8, 1, 0 }
  0x35   : > { %s3876_s4 = scalar_select %p3205_p10, 1, 0 }
  0x36   : > { %p3210_p13 = pnand %p2778_p6, %p154_p12  ;;  %s3063_s9 = smov [#allocation3]  }
  0x37   : > { %s172_s10 = sshll.u32 %s3063_s9, 4  ;;  %s2792_s11 = smul.u32 3, %s188_s22  ;;  %s3214_s10 = int_to_ptr.vmem [resolvable:$true] %s172_s10 }
  0x38   : > { %s3877_s8 = scalar_select %p3210_p13, 1, 0 }
  0x39   : > { %p2806_p0 = pneg %p3210_p13  ;;  %s2789_s19 = smul.u32 48, %s3053_s16 }
  0x3a   : > { %s214_s26 = scalar_lea.vmem [#allocation8], %s2792_s11  ;;  %s2913_s22 = scalar_lea.hbm %s3858_s0, 16384 }
  0x3b   : > { %p3223_p1 = pnand %p2806_p0, %p3863_p11  ;;  %s3230_s25 = scalar_lea.hbm %s3860_s2, %s2789_s19 }
  0x3c   : > { %s222_s27 = sshll.u32 %s214_s26, 4  ;;  %p2914_p3 = scmp.ne.s32.totalorder %s3858_s0, %s2913_s22  ;;  %s3232_s27 = int_to_ptr.vmem [resolvable:$true] %s222_s27 }
  0x3d   : > { %p2915_p2 = pneg %p3223_p1  ;;  %p2920_p12 = scmp.lt.u32.totalorder %s2913_s22, %s3858_s0 }
  0x3f   : > { %p2916_p4 = pnand %p2915_p2, %p2914_p3 }
  0x41   : > { %p2917_p6 = pneg %p2916_p4 }
  0x43   : > { %p2922_p0 = pnand %p2920_p12, %p2917_p6 }
  0x45   : > { %2925 = shalt.err (!%p2922_p0)
}
  0x46   : > { %s2926_s11 = scalar_lea.vmem %s3214_s10, 16384  ;;  %p2934_p8 = scmp.lt.s32.totalorder %s3214_s10, %s3214_s10 }
  0x47   : > { %p2927_p11 = scmp.ne.s32.totalorder %s3214_s10, %s2926_s11  ;;  %p2935_p5 = scmp.lt.s32.totalorder %s2926_s11, %s2926_s11 }
  0x49   : > { %p2929_p9 = pnand %p2927_p11, %p2915_p2  ;;  %p2936_p13 = por %p2935_p5, %p2934_p8 }
  0x4b   : > { %p2930_p10 = pneg %p2929_p9 }
  0x4d   : > { %p2937_p7 = pnand %p2936_p13, %p2930_p10 }
  0x4f   : > { %2940 = shalt.err (!%p2937_p7)
}
  0x50   : > { %s3064_s1 = smov 256   ;;  %s3065_s18 = smov 16  }
  0x51   : > { %2809 = dma.hbm_to_vmem [thread:$0]  (!%p3223_p1), %s3858_s0, 16384, %s3214_s10, [#allocation4], %s3064_s1, %s3064_s1, %s3065_s18  }
  0x52   : > { %s2941_s6 = scalar_lea.hbm %s3230_s25, 48  ;;  %p3879_p11 = scmp.ne.s32.totalorder %s3873_s29, 0 }
  0x53   : > { %p2942_p9 = scmp.ne.s32.totalorder %s3230_s25, %s2941_s6  ;;  %s2946_s21 = scalar_lea.hbm %s3860_s2, 96 }
  0x54   : > { %p3880_p5 = pneg %p3879_p11  ;;  %p2947_p10 = scmp.lt.u32.totalorder %s3230_s25, %s3860_s2 }
  0x55   : > { %p2948_p13 = scmp.lt.u32.totalorder %s2946_s21, %s2941_s6  ;;  %p2950_p2 = scmp.lt.u32.totalorder %s2941_s6, %s3230_s25 }
  0x56   : > { %p2944_p8 = pnand %p2942_p9, %p3880_p5 }
  0x57   : > { %p2949_p3 = por %p2948_p13, %p2947_p10 }
  0x58   : > { %p2945_p7 = pneg %p2944_p8 }
  0x59   : > { %p2951_p4 = por %p2950_p2, %p2949_p3 }
  0x5b   : > { %p2952_p6 = pnand %p2951_p4, %p2945_p7 }
  0x5d   : > { %2955 = shalt.err (!%p2952_p6)
}
  0x5e   : > { %s2956_s10 = scalar_lea.vmem %s3232_s27, 48  ;;  %p3881_p12 = pmov %p3880_p5 }
  0x5f   : > { %p2957_p1 = scmp.ne.s32.totalorder %s3232_s27, %s2956_s10  ;;  %s3066_s20 = smov [#allocation8]  }
  0x60   : > { %s2961_s1 = sshll.u32 %s3066_s20, 4  ;;  %s2962_s1 = int_to_ptr.vmem [resolvable:$false] %s2961_s1 }
  0x61   : > { %p2959_p0 = pnand %p2957_p1, %p3881_p12  ;;  %s2963_s18 = scalar_lea.vmem %s2962_s1, 96 }
  0x62   : > { %p2964_p5 = scmp.lt.s32.totalorder %s3232_s27, %s2962_s1  ;;  %p2965_p8 = scmp.lt.s32.totalorder %s2963_s18, %s2956_s10 }
  0x63   : > { %p2960_p9 = pneg %p2959_p0 }
  0x64   : > { %p2966_p10 = por %p2965_p8, %p2964_p5 }
  0x66   : > { %p2967_p13 = pnand %p2966_p10, %p2960_p9 }
  0x68   : > { %2970 = shalt.err (!%p2967_p13)
}
  0x69   : > { %2816 = dma.hbm_to_vmem [thread:$0]  (!%p3879_p11), %s3230_s25, 48, %s3232_s27, %s3155_s5  }
  0x6a   : > { %p3882_p7 = scmp.ne.s32.totalorder %s3877_s8, 0 }
  0x6b   : > { %p3883_p3 = scmp.eq.s32.totalorder (!%p3882_p7), %s3184_s30, 0 }
  0x6c   : > { %231 = sbr.rel (%p3882_p7) target bundleno = 670 (0x29e), region = 32 }
  0x73   : > { %3024 = dma.done.wait (%p3883_p3), [#allocation4], 16384   ;;  %p3884_p2 = pmov %p3883_p3 }
  0x74   : > { %s237_s19 = sand.u32 1, %s3184_s30   ;;  %s3287_s26 = sand.u32 1, %s3041_s13  }
  0x75   : > { %3026 = vsyncadd (%p3884_p2), [#allocation4], 4294950912  ;;  %s2793_s29 = smul.u32 768, %s3287_s26  ;;  %s238_s6 = scalar_lea.sflag [#allocation7], %s237_s19 }
  0x76   : > { %p3885_p11 = scmp.ne.s32.totalorder %s3874_s7, 0 }
  0x77   : > { %s3290_s9 = scalar_lea.vmem [#allocation6], %s2793_s29 }
  0x78   : > { %3028 = dma.done.wait (%p3885_p11), %s238_s6, 12336  }
  0x79   : > { %3030 = vsyncadd (%p3885_p11), %s238_s6, 4294954960  ;;  %v3067_v0 = vmov 0   ;;  %v867_v1 = vld [vmem:[%s3290_s9 + $0x8] sm:$0xff]  ;;  %v870_v2 = vld [vmem:[%s3290_s9 + $0x20] sm:$0xff]  ;;  %s2794_s5 = smul.u32 3, %s3287_s26  ;;  %s2633_s23 = scalar_lea.sflag [#allocation5], %s3287_s26 }
  0x7a   : > { %1363 = vmatprep.subr.bf16.mxu1 %v3067_v0  ;;  %v868_v3 = vld [vmem:[%s3290_s9 + $0x10] sm:$0xff]  ;;  %v963_v4 = vpack.c.bf16 %v870_v2, %v867_v1  ;;  %v871_v5 = vld [vmem:[%s3290_s9 + $0x28] sm:$0xff]  ;;  %v866_v6 = vld [vmem:[%s3290_s9] sm:$0xff]  ;;  %s2795_s7 = smul.u32 1536, %s3287_s26  ;;  %p3886_p6 = scmp.ne.s32.totalorder %s3875_s28, 0 }
  0x7b   : > { %v869_v7 = vld [vmem:[%s3290_s9 + $0x18] sm:$0xff]  ;;  %v964_v8 = vpack.c.bf16 %v871_v5, %v868_v3  ;;  %v876_v11 = vld [vmem:[%s3290_s9 + $0x50] sm:$0xff]  ;;  %v874_v12 = vld [vmem:[%s3290_s9 + $0x40] sm:$0xff]  ;;  %s250_s30 = scalar_lea.vmem [#allocation8], %s2794_s5  ;;  %s2790_s25 = smul.u32 384, %s3049_s15 }
  0x7c   : > { %v962_v9 = vpack.c.bf16 %v869_v7, %v866_v6  ;;  %v873_v10 = vld [vmem:[%s3290_s9 + $0x38] sm:$0xff]  ;;  %1010 = vmatprep.subr.bf16.mxu0 %v963_v4  ;;  %v872_v15 = vld [vmem:[%s3290_s9 + $0x30] sm:$0xff]  ;;  %v875_v16 = vld [vmem:[%s3290_s9 + $0x48] sm:$0xff]  ;;  %s3419_s8 = scalar_lea.vmem [#allocation9], %s2795_s7  ;;  %s3068_s10 = smov [#allocation9]  }
  0x7d   : > { %v966_v13 = vpack.c.bf16 %v876_v11, %v873_v10  ;;  %v877_v14 = vld [vmem:[%s3290_s9 + $0x58] sm:$0xff]  ;;  %1364 = vmatpush1.bf16.msra.mxu1 %v964_v8  ;;  %v965_v18 = vpack.c.bf16 %v875_v16, %v872_v15  ;;  %v879_v19 = vld [vmem:[%s3290_s9 + $0x68] sm:$0xff]  ;;  %v882_v20 = vld [vmem:[%s3290_s9 + $0x80] sm:$0xff]  ;;  %s2649_s27 = sshll.u32 %s3419_s8, 4  ;;  %s3798_s21 = scalar_lea.hbm %s3861_s3, %s2790_s25  ;;  %s3804_s27 = int_to_ptr.vmem [resolvable:$true] %s2649_s27 }
  0x7e   : > { %1011 = vmatpush1.bf16.msra.mxu0 %v962_v9  ;;  %v967_v17 = vpack.c.bf16 %v877_v14, %v874_v12  ;;  %v880_v21 = vld [vmem:[%s3290_s9 + $0x70] sm:$0xff]  ;;  %1365 = vmatprep.subr.bf16.mxu1 %v3067_v0  ;;  %v969_v22 = vpack.c.bf16 %v882_v20, %v879_v19  ;;  %v883_v23 = vld [vmem:[%s3290_s9 + $0x88] sm:$0xff]  ;;  %v878_v24 = vld [vmem:[%s3290_s9 + $0x60] sm:$0xff]  ;;  %s2971_s11 = scalar_lea.vmem %s3804_s27, 24576  ;;  %s2975_s20 = sshll.u32 %s3068_s10, 4  ;;  %s2976_s20 = int_to_ptr.vmem [resolvable:$false] %s2975_s20 }
  0x7f   : > { %1012 = vmatprep.subr.bf16.mxu0 %v966_v13  ;;  %v881_v25 = vld [vmem:[%s3290_s9 + $0x78] sm:$0xff]  ;;  %v888_v27 = vld [vmem:[%s3290_s9 + $0xb0] sm:$0xff]  ;;  %v970_v28 = vpack.c.bf16 %v883_v23, %v880_v21  ;;  %v886_v30 = vld [vmem:[%s3290_s9 + $0xa0] sm:$0xff]  ;;  %p2972_p4 = scmp.ne.s32.totalorder %s3804_s27, %s2971_s11  ;;  %s2977_s1 = scalar_lea.vmem %s2976_s20, 49152 }
  0x80   : > { %v885_v26 = vld [vmem:[%s3290_s9 + $0x98] sm:$0xff]  ;;  %v968_v29 = vpack.c.bf16 %v881_v25, %v878_v24  ;;  %v884_v33 = vld [vmem:[%s3290_s9 + $0x90] sm:$0xff]  ;;  %v887_v34 = vld [vmem:[%s3290_s9 + $0xa8] sm:$0xff]  ;;  %p2978_p0 = scmp.lt.s32.totalorder %s3804_s27, %s2976_s20  ;;  %p2979_p9 = scmp.lt.s32.totalorder %s2977_s1, %s2971_s11 }
  0x81   : > { %1366 = vmatpush1.bf16.msra.mxu1 %v967_v17  ;;  %v972_v31 = vpack.c.bf16 %v888_v27, %v885_v26  ;;  %v889_v32 = vld [vmem:[%s3290_s9 + $0xb8] sm:$0xff]  ;;  %v891_v35 = vld [vmem:[%s3290_s9 + $0xc8] sm:$0xff]  ;;  %v894_v36 = vld [vmem:[%s3290_s9 + $0xe0] sm:$0xff]  ;;  %v971_v38 = vpack.c.bf16 %v887_v34, %v884_v33  ;;  %p2973_p1 = pnand %p2972_p4, %p3886_p6 }
  0x82   : > { %1013 = vmatpush1.bf16.msra.mxu0 %v965_v18  ;;  %1367 = vmatprep.subr.bf16.mxu1 %v3067_v0  ;;  %v973_v37 = vpack.c.bf16 %v889_v32, %v886_v30  ;;  %v892_v39 = vld [vmem:[%s3290_s9 + $0xd0] sm:$0xff]  ;;  %v975_v40 = vpack.c.bf16 %v894_v36, %v891_v35  ;;  %v895_v41 = vld [vmem:[%s3290_s9 + $0xe8] sm:$0xff]  ;;  %v890_v42 = vld [vmem:[%s3290_s9 + $0xc0] sm:$0xff]  ;;  %p2980_p5 = por %p2979_p9, %p2978_p0 }
  0x83   : > { %1014 = vmatprep.subr.bf16.mxu0 %v969_v22  ;;  %v893_v43 = vld [vmem:[%s3290_s9 + $0xd8] sm:$0xff]  ;;  %v900_v45 = vld [vmem:[%s3290_s9 + $0x110] sm:$0xff]  ;;  %v976_v46 = vpack.c.bf16 %v895_v41, %v892_v39  ;;  %v898_v48 = vld [vmem:[%s3290_s9 + $0x100] sm:$0xff]  ;;  %p2974_p12 = pneg %p2973_p1 }
  0x84   : > { %v897_v44 = vld [vmem:[%s3290_s9 + $0xf8] sm:$0xff]  ;;  %v974_v47 = vpack.c.bf16 %v893_v43, %v890_v42  ;;  %v896_v51 = vld [vmem:[%s3290_s9 + $0xf0] sm:$0xff]  ;;  %v899_v52 = vld [vmem:[%s3290_s9 + $0x108] sm:$0xff] }
  0x85   : > { %1368 = vmatpush1.bf16.msra.mxu1 %v970_v28  ;;  %v978_v49 = vpack.c.bf16 %v900_v45, %v897_v44  ;;  %v901_v50 = vld [vmem:[%s3290_s9 + $0x118] sm:$0xff]  ;;  %v903_v53 = vld [vmem:[%s3290_s9 + $0x128] sm:$0xff]  ;;  %v906_v54 = vld [vmem:[%s3290_s9 + $0x140] sm:$0xff]  ;;  %v977_v56 = vpack.c.bf16 %v899_v52, %v896_v51  ;;  %p2981_p8 = pnand %p2980_p5, %p2974_p12 }
  0x86   : > { %1015 = vmatpush1.bf16.msra.mxu0 %v968_v29  ;;  %1369 = vmatprep.subr.bf16.mxu1 %v3067_v0  ;;  %v979_v55 = vpack.c.bf16 %v901_v50, %v898_v48  ;;  %v904_v57 = vld [vmem:[%s3290_s9 + $0x130] sm:$0xff]  ;;  %v981_v58 = vpack.c.bf16 %v906_v54, %v903_v53  ;;  %v907_v59 = vld [vmem:[%s3290_s9 + $0x148] sm:$0xff]  ;;  %v902_v60 = vld [vmem:[%s3290_s9 + $0x120] sm:$0xff] }
  0x87   : > { %1016 = vmatprep.subr.bf16.mxu0 %v972_v31  ;;  %v905_v61 = vld [vmem:[%s3290_s9 + $0x138] sm:$0xff]  ;;  %v912_v63 = vld [vmem:[%s3290_s9 + $0x170] sm:$0xff]  ;;  %v982_v1 = vpack.c.bf16 %v907_v59, %v904_v57  ;;  %v910_v3 = vld [vmem:[%s3290_s9 + $0x160] sm:$0xff] }
  0x88   : > { %v909_v62 = vld [vmem:[%s3290_s9 + $0x158] sm:$0xff]  ;;  %v980_v2 = vpack.c.bf16 %v905_v61, %v902_v60  ;;  %v908_v6 = vld [vmem:[%s3290_s9 + $0x150] sm:$0xff]  ;;  %v911_v7 = vld [vmem:[%s3290_s9 + $0x168] sm:$0xff] }
  0x89   : > { %1370 = vmatpush1.bf16.msra.mxu1 %v973_v37  ;;  %v984_v4 = vpack.c.bf16 %v912_v63, %v909_v62  ;;  %v913_v5 = vld [vmem:[%s3290_s9 + $0x178] sm:$0xff]  ;;  %v915_v8 = vld [vmem:[%s3290_s9 + $0x188] sm:$0xff]  ;;  %v918_v9 = vld [vmem:[%s3290_s9 + $0x1a0] sm:$0xff]  ;;  %v983_v11 = vpack.c.bf16 %v911_v7, %v908_v6 }
  0x8a   : > { %1017 = vmatpush1.bf16.msra.mxu0 %v971_v38  ;;  %1371 = vmatprep.subr.bf16.mxu1 %v3067_v0  ;;  %v985_v10 = vpack.c.bf16 %v913_v5, %v910_v3  ;;  %v916_v12 = vld [vmem:[%s3290_s9 + $0x190] sm:$0xff]  ;;  %v987_v13 = vpack.c.bf16 %v918_v9, %v915_v8  ;;  %v919_v14 = vld [vmem:[%s3290_s9 + $0x1a8] sm:$0xff]  ;;  %v914_v15 = vld [vmem:[%s3290_s9 + $0x180] sm:$0xff] }
  0x8b   : > { %1018 = vmatprep.subr.bf16.mxu0 %v975_v40  ;;  %v917_v16 = vld [vmem:[%s3290_s9 + $0x198] sm:$0xff]  ;;  %v924_v18 = vld [vmem:[%s3290_s9 + $0x1d0] sm:$0xff]  ;;  %v988_v19 = vpack.c.bf16 %v919_v14, %v916_v12  ;;  %v922_v21 = vld [vmem:[%s3290_s9 + $0x1c0] sm:$0xff] }
  0x8c   : > { %v921_v17 = vld [vmem:[%s3290_s9 + $0x1b8] sm:$0xff]  ;;  %v986_v20 = vpack.c.bf16 %v917_v16, %v914_v15  ;;  %v675_v22 = vld [vmem:[#allocation3 + $0x8] sm:$0xff]  ;;  %v920_v26 = vld [vmem:[%s3290_s9 + $0x1b0] sm:$0xff] }
  0x8d   : > { %1372 = vmatpush1.bf16.msra.mxu1 %v976_v46  ;;  %v677_v23 = vld [vmem:[#allocation3 + $0x18] sm:$0xff]  ;;  %v990_v24 = vpack.c.bf16 %v924_v18, %v921_v17  ;;  %v923_v27 = vld [vmem:[%s3290_s9 + $0x1c8] sm:$0xff]  ;;  %v930_v30 = vld [vmem:[%s3290_s9 + $0x200] sm:$0xff] }
  0x8e   : > { %1019 = vmatpush1.bf16.msra.mxu0 %v974_v47  ;;  %1373 = vmatprep.subr.bf16.mxu1 %v3067_v0  ;;  %v925_v25 = vld [vmem:[%s3290_s9 + $0x1d8] sm:$0xff]  ;;  %v803_v28 = vpack.c.bf16 %v677_v23, %v675_v22  ;;  %v927_v29 = vld [vmem:[%s3290_s9 + $0x1e8] sm:$0xff]  ;;  %v989_v32 = vpack.c.bf16 %v923_v27, %v920_v26  ;;  %v928_v33 = vld [vmem:[%s3290_s9 + $0x1f0] sm:$0xff] }
  0x8f   : > { %1020 = vmatprep.subr.bf16.mxu0 %v978_v49  ;;  %v991_v31 = vpack.c.bf16 %v925_v25, %v922_v21  ;;  %v993_v34 = vpack.c.bf16 %v930_v30, %v927_v29  ;;  %v931_v35 = vld [vmem:[%s3290_s9 + $0x208] sm:$0xff]  ;;  %v926_v36 = vld [vmem:[%s3290_s9 + $0x1e0] sm:$0xff]  ;;  %v929_v37 = vld [vmem:[%s3290_s9 + $0x1f8] sm:$0xff] }
  0x90   : > { %1395 = vmatprep.mubr.bf16.mxu1 %v803_v28  ;;  %1042 = vmatprep.mubr.bf16.mxu0 %v803_v28  ;;  %v933_v38 = vld [vmem:[%s3290_s9 + $0x218] sm:$0xff]  ;;  %v936_v39 = vld [vmem:[%s3290_s9 + $0x230] sm:$0xff]  ;;  %v994_v40 = vpack.c.bf16 %v931_v35, %v928_v33  ;;  %v992_v41 = vpack.c.bf16 %v929_v37, %v926_v36  ;;  %v934_v42 = vld [vmem:[%s3290_s9 + $0x220] sm:$0xff] }
  0x91   : > { %1374 = vmatpush1.bf16.msra.mxu1 %v979_v55  ;;  %v996_v43 = vpack.c.bf16 %v936_v39, %v933_v38  ;;  %v937_v44 = vld [vmem:[%s3290_s9 + $0x238] sm:$0xff]  ;;  %v932_v45 = vld [vmem:[%s3290_s9 + $0x210] sm:$0xff]  ;;  %v935_v46 = vld [vmem:[%s3290_s9 + $0x228] sm:$0xff] }
  0x92   : > { %1021 = vmatpush1.bf16.msra.mxu0 %v977_v56  ;;  %1375 = vmatprep.subr.bf16.mxu1 %v3067_v0  ;;  %v939_v47 = vld [vmem:[%s3290_s9 + $0x248] sm:$0xff]  ;;  %v942_v48 = vld [vmem:[%s3290_s9 + $0x260] sm:$0xff]  ;;  %v997_v49 = vpack.c.bf16 %v937_v44, %v934_v42  ;;  %v995_v50 = vpack.c.bf16 %v935_v46, %v932_v45  ;;  %v940_v51 = vld [vmem:[%s3290_s9 + $0x250] sm:$0xff] }
  0x93   : > { %1022 = vmatprep.subr.bf16.mxu0 %v981_v58  ;;  %v999_v52 = vpack.c.bf16 %v942_v48, %v939_v47  ;;  %v943_v53 = vld [vmem:[%s3290_s9 + $0x268] sm:$0xff]  ;;  %v938_v54 = vld [vmem:[%s3290_s9 + $0x240] sm:$0xff]  ;;  %v941_v55 = vld [vmem:[%s3290_s9 + $0x258] sm:$0xff] }
  0x94   : > { %v945_v56 = vld [vmem:[%s3290_s9 + $0x278] sm:$0xff]  ;;  %v948_v57 = vld [vmem:[%s3290_s9 + $0x290] sm:$0xff]  ;;  %v1000_v58 = vpack.c.bf16 %v943_v53, %v940_v51  ;;  %v998_v59 = vpack.c.bf16 %v941_v55, %v938_v54  ;;  %v946_v60 = vld [vmem:[%s3290_s9 + $0x280] sm:$0xff] }
  0x95   : > { %1376 = vmatpush1.bf16.msra.mxu1 %v982_v1  ;;  %v1002_v61 = vpack.c.bf16 %v948_v57, %v945_v56  ;;  %v949_v62 = vld [vmem:[%s3290_s9 + $0x298] sm:$0xff]  ;;  %v944_v63 = vld [vmem:[%s3290_s9 + $0x270] sm:$0xff]  ;;  %v947_v1 = vld [vmem:[%s3290_s9 + $0x288] sm:$0xff] }
  0x96   : > { %1023 = vmatpush1.bf16.msra.mxu0 %v980_v2  ;;  %1377 = vmatprep.subr.bf16.mxu1 %v3067_v0  ;;  %v951_v2 = vld [vmem:[%s3290_s9 + $0x2a8] sm:$0xff]  ;;  %v954_v3 = vld [vmem:[%s3290_s9 + $0x2c0] sm:$0xff]  ;;  %v1001_v5 = vpack.c.bf16 %v947_v1, %v944_v63  ;;  %v952_v6 = vld [vmem:[%s3290_s9 + $0x2b0] sm:$0xff] }
  0x97   : > { %1024 = vmatprep.subr.bf16.mxu0 %v984_v4  ;;  %v1003_v4 = vpack.c.bf16 %v949_v62, %v946_v60  ;;  %v1005_v7 = vpack.c.bf16 %v954_v3, %v951_v2  ;;  %v955_v8 = vld [vmem:[%s3290_s9 + $0x2c8] sm:$0xff]  ;;  %v950_v9 = vld [vmem:[%s3290_s9 + $0x2a0] sm:$0xff]  ;;  %v960_v12 = vld [vmem:[%s3290_s9 + $0x2f0] sm:$0xff] }
  0x98   : > { %v958_v15 = vld [vmem:[%s3290_s9 + $0x2e0] sm:$0xff]  ;;  %v961_v17 = vld [vmem:[%s3290_s9 + $0x2f8] sm:$0xff]  ;;  %v956_v18 = vld [vmem:[%s3290_s9 + $0x2d0] sm:$0xff] }
  0x99   : > { %1378 = vmatpush1.bf16.msra.mxu1 %v985_v10  ;;  %v953_v10 = vld [vmem:[%s3290_s9 + $0x2b8] sm:$0xff]  ;;  %v674_v22 = vld [vmem:[#allocation3] sm:$0xff]  ;;  %v676_v23 = vld [vmem:[#allocation3 + $0x10] sm:$0xff] }
  0x9a   : > { %1025 = vmatpush1.bf16.msra.mxu0 %v983_v11  ;;  %1379 = vmatprep.subr.bf16.mxu1 %v3067_v0  ;;  %v957_v11 = vld [vmem:[%s3290_s9 + $0x2d8] sm:$0xff]  ;;  %v1004_v14 = vpack.c.bf16 %v953_v10, %v950_v9  ;;  %v802_v26 = vpack.c.bf16 %v676_v23, %v674_v22  ;;  %v678_v28 = vld [vmem:[#allocation3 + $0x20] sm:$0xff]  ;;  %v680_v29 = vld [vmem:[#allocation3 + $0x30] sm:$0xff] }
  0x9b   : > { %1026 = vmatprep.subr.bf16.mxu0 %v987_v13  ;;  %v1006_v13 = vpack.c.bf16 %v955_v8, %v952_v6  ;;  %v1008_v16 = vpack.c.bf16 %v960_v12, %v957_v11  ;;  %v681_v25 = vld [vmem:[#allocation3 + $0x38] sm:$0xff]  ;;  %v683_v30 = vld [vmem:[#allocation3 + $0x48] sm:$0xff]  ;;  %v686_v39 = vld [vmem:[#allocation3 + $0x60] sm:$0xff] }
  0x9c   : > { %v687_v35 = vld [vmem:[#allocation3 + $0x68] sm:$0xff]  ;;  %v689_v36 = vld [vmem:[#allocation3 + $0x78] sm:$0xff]  ;;  %v690_v45 = vld [vmem:[#allocation3 + $0x80] sm:$0xff] }
  0x9d   : > { %1380 = vmatpush1.bf16.msra.mxu1 %v988_v19  ;;  %v959_v19 = vld [vmem:[%s3290_s9 + $0x2e8] sm:$0xff]  ;;  %v809_v38 = vpack.c.bf16 %v689_v36, %v687_v35  ;;  %v693_v42 = vld [vmem:[#allocation3 + $0x98] sm:$0xff]  ;;  %v692_v46 = vld [vmem:[#allocation3 + $0x90] sm:$0xff] }
  0x9e   : > { %1027 = vmatpush1.bf16.msra.mxu0 %v986_v20  ;;  %1381 = vmatprep.subr.bf16.mxu1 %v3067_v0  ;;  %v1009_v20 = vpack.c.bf16 %v961_v17, %v958_v15  ;;  %v1007_v21 = vpack.c.bf16 %v959_v19, %v956_v18  ;;  %v695_v47 = vld [vmem:[#allocation3 + $0xa8] sm:$0xff]  ;;  %v697_v48 = vld [vmem:[#allocation3 + $0xb8] sm:$0xff]  ;;  %v694_v51 = vld [vmem:[#allocation3 + $0xa0] sm:$0xff] }
  0x9f   : > { %1028 = vmatprep.subr.bf16.mxu0 %v990_v24  ;;  %v679_v24 = vld [vmem:[#allocation3 + $0x28] sm:$0xff]  ;;  %v701_v54 = vld [vmem:[#allocation3 + $0xd8] sm:$0xff]  ;;  %v698_v57 = vld [vmem:[#allocation3 + $0xc0] sm:$0xff] }
  0xa0   : > { %v805_v27 = vpack.c.bf16 %v681_v25, %v679_v24  ;;  %v699_v53 = vld [vmem:[#allocation3 + $0xc8] sm:$0xff]  ;;  %v705_v60 = vld [vmem:[#allocation3 + $0xf8] sm:$0xff]  ;;  %v702_v63 = vld [vmem:[#allocation3 + $0xe0] sm:$0xff] }
  0xa1   : > { %1382 = vmatpush1.bf16.msra.mxu1 %v991_v31  ;;  %v685_v31 = vld [vmem:[#allocation3 + $0x58] sm:$0xff]  ;;  %v815_v56 = vpack.c.bf16 %v701_v54, %v699_v53  ;;  %v704_v1 = vld [vmem:[#allocation3 + $0xf0] sm:$0xff]  ;;  %v707_v2 = vld [vmem:[#allocation3 + $0x108] sm:$0xff] }
  0xa2   : > { %1029 = vmatpush1.bf16.msra.mxu0 %v989_v32  ;;  %1383 = vmatprep.subr.bf16.mxu1 %v3067_v0  ;;  %v804_v32 = vpack.c.bf16 %v680_v29, %v678_v28  ;;  %v807_v33 = vpack.c.bf16 %v685_v31, %v683_v30  ;;  %v709_v3 = vld [vmem:[#allocation3 + $0x118] sm:$0xff]  ;;  %v706_v6 = vld [vmem:[#allocation3 + $0x100] sm:$0xff]  ;;  %v711_v8 = vld [vmem:[#allocation3 + $0x128] sm:$0xff] }
  0xa3   : > { %1030 = vmatprep.subr.bf16.mxu0 %v993_v34  ;;  %v684_v34 = vld [vmem:[#allocation3 + $0x50] sm:$0xff]  ;;  %v713_v9 = vld [vmem:[#allocation3 + $0x138] sm:$0xff]  ;;  %v710_v12 = vld [vmem:[#allocation3 + $0x120] sm:$0xff] }
  0xa4   : > { %v821_v11 = vpack.c.bf16 %v713_v9, %v711_v8  ;;  %v717_v15 = vld [vmem:[#allocation3 + $0x158] sm:$0xff]  ;;  %v714_v18 = vld [vmem:[#allocation3 + $0x140] sm:$0xff]  ;;  %v716_v19 = vld [vmem:[#allocation3 + $0x150] sm:$0xff] }
  0xa5   : > { %1384 = vmatpush1.bf16.msra.mxu1 %v994_v40  ;;  %v688_v40 = vld [vmem:[#allocation3 + $0x70] sm:$0xff]  ;;  %v822_v22 = vpack.c.bf16 %v716_v19, %v714_v18  ;;  %v718_v24 = vld [vmem:[#allocation3 + $0x160] sm:$0xff] }
  0xa6   : > { %1031 = vmatpush1.bf16.msra.mxu0 %v992_v41  ;;  %1385 = vmatprep.subr.bf16.mxu1 %v3067_v0  ;;  %v691_v41 = vld [vmem:[#allocation3 + $0x88] sm:$0xff]  ;;  %v720_v25 = vld [vmem:[#allocation3 + $0x170] sm:$0xff]  ;;  %v722_v30 = vld [vmem:[#allocation3 + $0x180] sm:$0xff] }
  0xa7   : > { %1032 = vmatprep.subr.bf16.mxu0 %v996_v43  ;;  %v808_v43 = vpack.c.bf16 %v688_v40, %v686_v39  ;;  %v811_v44 = vpack.c.bf16 %v693_v42, %v691_v41  ;;  %v824_v28 = vpack.c.bf16 %v720_v25, %v718_v24  ;;  %v724_v31 = vld [vmem:[#allocation3 + $0x190] sm:$0xff]  ;;  %v726_v35 = vld [vmem:[#allocation3 + $0x1a0] sm:$0xff] }
  0xa8   : > { %v728_v36 = vld [vmem:[#allocation3 + $0x1b0] sm:$0xff]  ;;  %v730_v41 = vld [vmem:[#allocation3 + $0x1c0] sm:$0xff] }
  0xa9   : > { %1386 = vmatpush1.bf16.msra.mxu1 %v997_v49  ;;  %v810_v49 = vpack.c.bf16 %v692_v46, %v690_v45  ;;  %v828_v39 = vpack.c.bf16 %v728_v36, %v726_v35  ;;  %v732_v42 = vld [vmem:[#allocation3 + $0x1d0] sm:$0xff]  ;;  %v738_v53 = vld [vmem:[#allocation3 + $0x200] sm:$0xff] }
  0xaa   : > { %1033 = vmatpush1.bf16.msra.mxu0 %v995_v50  ;;  %1387 = vmatprep.subr.bf16.mxu1 %v3067_v0  ;;  %v813_v50 = vpack.c.bf16 %v697_v48, %v695_v47  ;;  %v830_v45 = vpack.c.bf16 %v732_v42, %v730_v41  ;;  %v734_v47 = vld [vmem:[#allocation3 + $0x1e0] sm:$0xff]  ;;  %v736_v48 = vld [vmem:[#allocation3 + $0x1f0] sm:$0xff] }
  0xab   : > { %1034 = vmatprep.subr.bf16.mxu0 %v999_v52  ;;  %v696_v52 = vld [vmem:[#allocation3 + $0xb0] sm:$0xff]  ;;  %v750_v8 = vld [vmem:[#allocation3 + $0x260] sm:$0xff] }
  0xac   : > { %v812_v55 = vpack.c.bf16 %v696_v52, %v694_v51  ;;  %v832_v51 = vpack.c.bf16 %v736_v48, %v734_v47  ;;  %v740_v54 = vld [vmem:[#allocation3 + $0x210] sm:$0xff]  ;;  %v2233_v48 = vlaneseq }
  0xad   : > { %1388 = vmatpush1.bf16.msra.mxu1 %v1000_v58  ;;  %v700_v58 = vld [vmem:[#allocation3 + $0xd0] sm:$0xff] }
  0xae   : > { %1035 = vmatpush1.bf16.msra.mxu0 %v998_v59  ;;  %1389 = vmatprep.subr.bf16.mxu1 %v3067_v0  ;;  %v703_v59 = vld [vmem:[#allocation3 + $0xe8] sm:$0xff]  ;;  %v752_v9 = vld [vmem:[#allocation3 + $0x270] sm:$0xff] }
  0xaf   : > { %1036 = vmatprep.subr.bf16.mxu0 %v1002_v61  ;;  %v814_v61 = vpack.c.bf16 %v700_v58, %v698_v57  ;;  %v817_v62 = vpack.c.bf16 %v705_v60, %v703_v59  ;;  %v834_v57 = vpack.c.bf16 %v740_v54, %v738_v53  ;;  %v742_v59 = vld [vmem:[#allocation3 + $0x220] sm:$0xff]  ;;  %v744_v60 = vld [vmem:[#allocation3 + $0x230] sm:$0xff]  ;;  %v783_v53 = vld [vmem:[#allocation3 + $0x368] sm:$0xff] }
  0xb0   : > { %v785_v54 = vld [vmem:[#allocation3 + $0x378] sm:$0xff] }
  0xb1   : > { %1390 = vmatpush1.bf16.msra.mxu1 %v1003_v4  ;;  %v816_v4 = vpack.c.bf16 %v704_v1, %v702_v63  ;;  %v836_v63 = vpack.c.bf16 %v744_v60, %v742_v59  ;;  %v857_v60 = vpack.c.bf16 %v785_v54, %v783_v53 }
  0xb2   : > { %1037 = vmatpush1.bf16.msra.mxu0 %v1001_v5  ;;  %1391 = vmatprep.subr.bf16.mxu1 %v3067_v0  ;;  %v819_v5 = vpack.c.bf16 %v709_v3, %v707_v2  ;;  %v746_v2 = vld [vmem:[#allocation3 + $0x240] sm:$0xff]  ;;  %v748_v3 = vld [vmem:[#allocation3 + $0x250] sm:$0xff] }
  0xb3   : > { %1038 = vmatprep.subr.bf16.mxu0 %v1005_v7  ;;  %v708_v7 = vld [vmem:[#allocation3 + $0x110] sm:$0xff] }
  0xb4   : > { %v818_v10 = vpack.c.bf16 %v708_v7, %v706_v6  ;;  %v838_v6 = vpack.c.bf16 %v748_v3, %v746_v2  ;;  %v784_v2 = vld [vmem:[#allocation3 + $0x370] sm:$0xff]  ;;  %v787_v3 = vld [vmem:[#allocation3 + $0x388] sm:$0xff] }
  0xb5   : > { %1392 = vmatpush1.bf16.msra.mxu1 %v1006_v13  ;;  %v712_v13 = vld [vmem:[#allocation3 + $0x130] sm:$0xff] }
  0xb6   : > { %1039 = vmatpush1.bf16.msra.mxu0 %v1004_v14  ;;  %1393 = vmatprep.subr.bf16.mxu1 %v3067_v0  ;;  %v682_v0 = vld [vmem:[#allocation3 + $0x40] sm:$0xff]  ;;  %v715_v14 = vld [vmem:[#allocation3 + $0x148] sm:$0xff] }
  0xb7   : > { %1040 = vmatprep.subr.bf16.mxu0 %v1008_v16  ;;  %v806_v37 = vpack.c.bf16 %v684_v34, %v682_v0  ;;  %v820_v16 = vpack.c.bf16 %v712_v13, %v710_v12  ;;  %v823_v17 = vpack.c.bf16 %v717_v15, %v715_v14  ;;  %v826_v0 = vpack.c.bf16 %v724_v31, %v722_v30  ;;  %v754_v14 = vld [vmem:[#allocation3 + $0x280] sm:$0xff]  ;;  %v756_v15 = vld [vmem:[#allocation3 + $0x290] sm:$0xff] }
  0xb8   : > { %v840_v12 = vpack.c.bf16 %v752_v9, %v750_v8  ;;  %v842_v18 = vpack.c.bf16 %v756_v15, %v754_v14 }
  0xb9   : > { %1394 = vmatpush1.bf16.msra.mxu1 %v1009_v20  ;;  %v719_v20 = vld [vmem:[#allocation3 + $0x168] sm:$0xff] }
  0xba   : > { %1041 = vmatpush1.bf16.msra.mxu0 %v1007_v21  ;;  %v721_v21 = vld [vmem:[#allocation3 + $0x178] sm:$0xff] }
  0xbb   : > { %v825_v23 = vpack.c.bf16 %v721_v21, %v719_v20  ;;  %v758_v20 = vld [vmem:[#allocation3 + $0x2a0] sm:$0xff]  ;;  %v760_v21 = vld [vmem:[#allocation3 + $0x2b0] sm:$0xff] }
  0xbc   : > { %1396 = vmatmul.mubr.bf16.vlgmr.msra.gmra.mrb[0].mxu1 %v802_v26  ;;  %v844_v24 = vpack.c.bf16 %v760_v21, %v758_v20  ;;  %v786_v21 = vld [vmem:[#allocation3 + $0x380] sm:$0xff] }
  0xbd   : > { %1043 = vmatmul.mubr.bf16.vlgmr.msra.gmra.mrb[0].mxu0 %v802_v26  ;;  %1403 = vmatprep.mubr.bf16.mxu1 %v805_v27  ;;  %v723_v26 = vld [vmem:[#allocation3 + $0x188] sm:$0xff] }
  0xbe   : > { %1052 = vmatprep.mubr.bf16.mxu0 %v805_v27  ;;  %v725_v27 = vld [vmem:[#allocation3 + $0x198] sm:$0xff] }
  0xbf   : > { %v827_v29 = vpack.c.bf16 %v725_v27, %v723_v26  ;;  %v762_v26 = vld [vmem:[#allocation3 + $0x2c0] sm:$0xff]  ;;  %v764_v27 = vld [vmem:[#allocation3 + $0x2d0] sm:$0xff] }
  0xc0   : > { %v846_v30 = vpack.c.bf16 %v764_v27, %v762_v26 }
  0xc4   : > { %1404 = vmatmul.mubr.bf16.gmra.mrb[4].mxu1 %v804_v32 }
  0xc5   : > { %1053 = vmatmul.mubr.bf16.gmra.mrb[4].mxu0 %v804_v32  ;;  %1411 = vmatprep.mubr.bf16.mxu1 %v807_v33  ;;  %v727_v32 = vld [vmem:[#allocation3 + $0x1a8] sm:$0xff] }
  0xc6   : > { %1062 = vmatprep.mubr.bf16.mxu0 %v807_v33  ;;  %v729_v33 = vld [vmem:[#allocation3 + $0x1b8] sm:$0xff] }
  0xc7   : > { %v829_v34 = vpack.c.bf16 %v729_v33, %v727_v32  ;;  %v766_v32 = vld [vmem:[#allocation3 + $0x2e0] sm:$0xff]  ;;  %v768_v33 = vld [vmem:[#allocation3 + $0x2f0] sm:$0xff] }
  0xc8   : > { %v848_v35 = vpack.c.bf16 %v768_v33, %v766_v32 }
  0xcc   : > { %1412 = vmatmul.mubr.bf16.gmra.mrb[8].mxu1 %v806_v37 }
  0xcd   : > { %1063 = vmatmul.mubr.bf16.gmra.mrb[8].mxu0 %v806_v37  ;;  %1419 = vmatprep.mubr.bf16.mxu1 %v809_v38  ;;  %v731_v37 = vld [vmem:[#allocation3 + $0x1c8] sm:$0xff] }
  0xce   : > { %1072 = vmatprep.mubr.bf16.mxu0 %v809_v38  ;;  %v733_v38 = vld [vmem:[#allocation3 + $0x1d8] sm:$0xff] }
  0xcf   : > { %v831_v40 = vpack.c.bf16 %v733_v38, %v731_v37  ;;  %v770_v37 = vld [vmem:[#allocation3 + $0x300] sm:$0xff]  ;;  %v772_v38 = vld [vmem:[#allocation3 + $0x310] sm:$0xff] }
  0xd0   : > { %v850_v41 = vpack.c.bf16 %v772_v38, %v770_v37 }
  0xd4   : > { %1420 = vmatmul.mubr.bf16.gmra.mrb[12].mxu1 %v808_v43 }
  0xd5   : > { %1073 = vmatmul.mubr.bf16.gmra.mrb[12].mxu0 %v808_v43  ;;  %1427 = vmatprep.mubr.bf16.mxu1 %v811_v44  ;;  %v735_v43 = vld [vmem:[#allocation3 + $0x1e8] sm:$0xff] }
  0xd6   : > { %1082 = vmatprep.mubr.bf16.mxu0 %v811_v44  ;;  %v737_v44 = vld [vmem:[#allocation3 + $0x1f8] sm:$0xff] }
  0xd7   : > { %v833_v46 = vpack.c.bf16 %v737_v44, %v735_v43  ;;  %v774_v43 = vld [vmem:[#allocation3 + $0x320] sm:$0xff]  ;;  %v776_v44 = vld [vmem:[#allocation3 + $0x330] sm:$0xff] }
  0xd8   : > { %v852_v47 = vpack.c.bf16 %v776_v44, %v774_v43  ;;  %v797_v43 = vld [vmem:[#allocation3 + $0x3d8] sm:$0xff] }
  0xdc   : > { %1428 = vmatmul.mubr.bf16.gmra.mrb[16].mxu1 %v810_v49 }
  0xdd   : > { %1083 = vmatmul.mubr.bf16.gmra.mrb[16].mxu0 %v810_v49  ;;  %1435 = vmatprep.mubr.bf16.mxu1 %v813_v50  ;;  %v739_v49 = vld [vmem:[#allocation3 + $0x208] sm:$0xff] }
  0xde   : > { %1092 = vmatprep.mubr.bf16.mxu0 %v813_v50  ;;  %v741_v50 = vld [vmem:[#allocation3 + $0x218] sm:$0xff] }
  0xdf   : > { %v835_v52 = vpack.c.bf16 %v741_v50, %v739_v49  ;;  %v2234_v50 = vshrl.u32 %v2233_v48, 7 }
  0xe1   : > { %v2239_v59 = vsub.s32 1, %v2234_v50 }
  0xe4   : > { %1436 = vmatmul.mubr.bf16.gmra.mrb[20].mxu1 %v812_v55 }
  0xe5   : > { %1093 = vmatmul.mubr.bf16.gmra.mrb[20].mxu0 %v812_v55  ;;  %1443 = vmatprep.mubr.bf16.mxu1 %v815_v56  ;;  %v743_v55 = vld [vmem:[#allocation3 + $0x228] sm:$0xff] }
  0xe6   : > { %1102 = vmatprep.mubr.bf16.mxu0 %v815_v56  ;;  %v745_v56 = vld [vmem:[#allocation3 + $0x238] sm:$0xff] }
  0xe7   : > { %v837_v58 = vpack.c.bf16 %v745_v56, %v743_v55  ;;  %v2243_v56 = vsub.s32 2, %v2234_v50 }
  0xec   : > { %1444 = vmatmul.mubr.bf16.gmra.mrb[24].mxu1 %v814_v61 }
  0xed   : > { %1103 = vmatmul.mubr.bf16.gmra.mrb[24].mxu0 %v814_v61  ;;  %1451 = vmatprep.mubr.bf16.mxu1 %v817_v62  ;;  %v747_v61 = vld [vmem:[#allocation3 + $0x248] sm:$0xff] }
  0xee   : > { %1112 = vmatprep.mubr.bf16.mxu0 %v817_v62  ;;  %v749_v62 = vld [vmem:[#allocation3 + $0x258] sm:$0xff] }
  0xef   : > { %v839_v1 = vpack.c.bf16 %v749_v62, %v747_v61 }
  0xf4   : > { %1452 = vmatmul.mubr.bf16.gmra.mrb[28].mxu1 %v816_v4 }
  0xf5   : > { %1113 = vmatmul.mubr.bf16.gmra.mrb[28].mxu0 %v816_v4  ;;  %1459 = vmatprep.mubr.bf16.mxu1 %v819_v5  ;;  %v751_v4 = vld [vmem:[#allocation3 + $0x268] sm:$0xff] }
  0xf6   : > { %1122 = vmatprep.mubr.bf16.mxu0 %v819_v5  ;;  %v753_v5 = vld [vmem:[#allocation3 + $0x278] sm:$0xff] }
  0xf7   : > { %v841_v7 = vpack.c.bf16 %v753_v5, %v751_v4  ;;  %v789_v4 = vld [vmem:[#allocation3 + $0x398] sm:$0xff] }
  0xf8   : > { %v859_v15 = vpack.c.bf16 %v789_v4, %v787_v3  ;;  %v801_v3 = vld [vmem:[#allocation3 + $0x3f8] sm:$0xff] }
  0xfc   : > { %1460 = vmatmul.mubr.bf16.gmra.mrb[32].mxu1 %v818_v10 }
  0xfd   : > { %1123 = vmatmul.mubr.bf16.gmra.mrb[32].mxu0 %v818_v10  ;;  %1467 = vmatprep.mubr.bf16.mxu1 %v821_v11  ;;  %v755_v10 = vld [vmem:[#allocation3 + $0x288] sm:$0xff] }
  0xfe   : > { %1132 = vmatprep.mubr.bf16.mxu0 %v821_v11  ;;  %v757_v11 = vld [vmem:[#allocation3 + $0x298] sm:$0xff] }
  0xff   : > { %v843_v13 = vpack.c.bf16 %v757_v11, %v755_v10 }
 0x104   : > { %1468 = vmatmul.mubr.bf16.gmra.mrb[36].mxu1 %v820_v16 }
 0x105   : > { %1133 = vmatmul.mubr.bf16.gmra.mrb[36].mxu0 %v820_v16  ;;  %1475 = vmatprep.mubr.bf16.mxu1 %v823_v17  ;;  %v759_v16 = vld [vmem:[#allocation3 + $0x2a8] sm:$0xff] }
 0x106   : > { %1142 = vmatprep.mubr.bf16.mxu0 %v823_v17  ;;  %v761_v17 = vld [vmem:[#allocation3 + $0x2b8] sm:$0xff] }
 0x107   : > { %v845_v19 = vpack.c.bf16 %v761_v17, %v759_v16 }
 0x10c   : > { %1476 = vmatmul.mubr.bf16.gmra.mrb[40].mxu1 %v822_v22 }
 0x10d   : > { %1143 = vmatmul.mubr.bf16.gmra.mrb[40].mxu0 %v822_v22  ;;  %1483 = vmatprep.mubr.bf16.mxu1 %v825_v23  ;;  %v763_v22 = vld [vmem:[#allocation3 + $0x2c8] sm:$0xff] }
 0x10e   : > { %1152 = vmatprep.mubr.bf16.mxu0 %v825_v23  ;;  %v765_v23 = vld [vmem:[#allocation3 + $0x2d8] sm:$0xff] }
 0x10f   : > { %v847_v25 = vpack.c.bf16 %v765_v23, %v763_v22  ;;  %v788_v22 = vld [vmem:[#allocation3 + $0x390] sm:$0xff]  ;;  %v791_v23 = vld [vmem:[#allocation3 + $0x3a8] sm:$0xff] }
 0x114   : > { %1484 = vmatmul.mubr.bf16.gmra.mrb[44].mxu1 %v824_v28 }
 0x115   : > { %1153 = vmatmul.mubr.bf16.gmra.mrb[44].mxu0 %v824_v28  ;;  %1491 = vmatprep.mubr.bf16.mxu1 %v827_v29  ;;  %v767_v28 = vld [vmem:[#allocation3 + $0x2e8] sm:$0xff] }
 0x116   : > { %1162 = vmatprep.mubr.bf16.mxu0 %v827_v29  ;;  %v769_v29 = vld [vmem:[#allocation3 + $0x2f8] sm:$0xff] }
 0x117   : > { %v849_v31 = vpack.c.bf16 %v769_v29, %v767_v28 }
 0x11c   : > { %1492 = vmatmul.mubr.bf16.gmra.mrb[48].mxu1 %v826_v0 }
 0x11d   : > { %1163 = vmatmul.mubr.bf16.gmra.mrb[48].mxu0 %v826_v0  ;;  %1499 = vmatprep.mubr.bf16.mxu1 %v829_v34  ;;  %v771_v0 = vld [vmem:[#allocation3 + $0x308] sm:$0xff] }
 0x11e   : > { %1172 = vmatprep.mubr.bf16.mxu0 %v829_v34  ;;  %v773_v34 = vld [vmem:[#allocation3 + $0x318] sm:$0xff] }
 0x11f   : > { %v851_v36 = vpack.c.bf16 %v773_v34, %v771_v0 }
 0x124   : > { %1500 = vmatmul.mubr.bf16.gmra.mrb[52].mxu1 %v828_v39 }
 0x125   : > { %1173 = vmatmul.mubr.bf16.gmra.mrb[52].mxu0 %v828_v39  ;;  %1507 = vmatprep.mubr.bf16.mxu1 %v831_v40  ;;  %v775_v39 = vld [vmem:[#allocation3 + $0x328] sm:$0xff] }
 0x126   : > { %1182 = vmatprep.mubr.bf16.mxu0 %v831_v40  ;;  %v777_v40 = vld [vmem:[#allocation3 + $0x338] sm:$0xff] }
 0x127   : > { %v853_v42 = vpack.c.bf16 %v777_v40, %v775_v39  ;;  %v790_v40 = vld [vmem:[#allocation3 + $0x3a0] sm:$0xff] }
 0x12c   : > { %1508 = vmatmul.mubr.bf16.gmra.mrb[56].mxu1 %v830_v45 }
 0x12d   : > { %1183 = vmatmul.mubr.bf16.gmra.mrb[56].mxu0 %v830_v45  ;;  %1515 = vmatprep.mubr.bf16.mxu1 %v833_v46  ;;  %v779_v45 = vld [vmem:[#allocation3 + $0x348] sm:$0xff] }
 0x12e   : > { %1192 = vmatprep.mubr.bf16.mxu0 %v833_v46  ;;  %v781_v46 = vld [vmem:[#allocation3 + $0x358] sm:$0xff] }
 0x12f   : > { %v855_v49 = vpack.c.bf16 %v781_v46, %v779_v45 }
 0x134   : > { %1516 = vmatmul.mubr.bf16.gmra.mrb[60].mxu1 %v832_v51 }
 0x135   : > { %1193 = vmatmul.mubr.bf16.gmra.mrb[60].mxu0 %v832_v51  ;;  %1523 = vmatprep.mubr.bf16.mxu1 %v835_v52  ;;  %v778_v51 = vld [vmem:[#allocation3 + $0x340] sm:$0xff] }
 0x136   : > { %1202 = vmatprep.mubr.bf16.mxu0 %v835_v52  ;;  %v780_v52 = vld [vmem:[#allocation3 + $0x350] sm:$0xff] }
 0x137   : > { %v854_v55 = vpack.c.bf16 %v780_v52, %v778_v51 }
 0x13c   : > { %1524 = vmatmul.mubr.bf16.gmra.mrb[64].mxu1 %v834_v57 }
 0x13d   : > { %1203 = vmatmul.mubr.bf16.gmra.mrb[64].mxu0 %v834_v57  ;;  %1531 = vmatprep.mubr.bf16.mxu1 %v837_v58  ;;  %v2235_v57 = vsub.s32 0, %v2234_v50 }
 0x13e   : > { %1212 = vmatprep.mubr.bf16.mxu0 %v837_v58  ;;  %v2231_v58 = vld [vmem:[%s250_s30] sm:$0x7] }
 0x13f   : > { %v3410_v61 = vrot.slane %v2231_v58, %v2243_v56  ;;  %v3412_v62 = vrot.slane %v2231_v58, %v2235_v57 }
 0x144   : > { %1532 = vmatmul.mubr.bf16.gmra.mrb[68].mxu1 %v836_v63 }
 0x145   : > { %1213 = vmatmul.mubr.bf16.gmra.mrb[68].mxu0 %v836_v63  ;;  %1539 = vmatprep.mubr.bf16.mxu1 %v839_v1  ;;  %v3414_v63 = vrot.slane %v2231_v58, %v2239_v59 }
 0x146   : > { %1222 = vmatprep.mubr.bf16.mxu0 %v839_v1  ;;  %v782_v1 = vld [vmem:[#allocation3 + $0x360] sm:$0xff] }
 0x147   : > { %v856_v11 = vpack.c.bf16 %v784_v2, %v782_v1  ;;  %v796_v1 = vld [vmem:[#allocation3 + $0x3d0] sm:$0xff]  ;;  %v799_v2 = vld [vmem:[#allocation3 + $0x3e8] sm:$0xff] }
 0x14c   : > { %1540 = vmatmul.mubr.bf16.gmra.mrb[72].mxu1 %v838_v6 }
 0x14d   : > { %1223 = vmatmul.mubr.bf16.gmra.mrb[72].mxu0 %v838_v6  ;;  %1547 = vmatprep.mubr.bf16.mxu1 %v841_v7 }
 0x14e   : > { %1232 = vmatprep.mubr.bf16.mxu0 %v841_v7 }
 0x154   : > { %1548 = vmatmul.mubr.bf16.gmra.mrb[76].mxu1 %v840_v12 }
 0x155   : > { %1233 = vmatmul.mubr.bf16.gmra.mrb[76].mxu0 %v840_v12  ;;  %1555 = vmatprep.mubr.bf16.mxu1 %v843_v13 }
 0x156   : > { %1242 = vmatprep.mubr.bf16.mxu0 %v843_v13 }
 0x15c   : > { %1556 = vmatmul.mubr.bf16.gmra.mrb[80].mxu1 %v842_v18 }
 0x15d   : > { %1243 = vmatmul.mubr.bf16.gmra.mrb[80].mxu0 %v842_v18  ;;  %1563 = vmatprep.mubr.bf16.mxu1 %v845_v19 }
 0x15e   : > { %1252 = vmatprep.mubr.bf16.mxu0 %v845_v19 }
 0x164   : > { %1564 = vmatmul.mubr.bf16.gmra.mrb[84].mxu1 %v844_v24 }
 0x165   : > { %1253 = vmatmul.mubr.bf16.gmra.mrb[84].mxu0 %v844_v24  ;;  %1571 = vmatprep.mubr.bf16.mxu1 %v847_v25  ;;  %v793_v24 = vld [vmem:[#allocation3 + $0x3b8] sm:$0xff] }
 0x166   : > { %1262 = vmatprep.mubr.bf16.mxu0 %v847_v25  ;;  %v861_v34 = vpack.c.bf16 %v793_v24, %v791_v23 }
 0x16c   : > { %1572 = vmatmul.mubr.bf16.gmra.mrb[88].mxu1 %v846_v30 }
 0x16d   : > { %1263 = vmatmul.mubr.bf16.gmra.mrb[88].mxu0 %v846_v30  ;;  %1579 = vmatprep.mubr.bf16.mxu1 %v849_v31 }
 0x16e   : > { %1272 = vmatprep.mubr.bf16.mxu0 %v849_v31  ;;  %v858_v31 = vpack.c.bf16 %v788_v22, %v786_v21  ;;  %v800_v21 = vld [vmem:[#allocation3 + $0x3f0] sm:$0xff] }
 0x174   : > { %1580 = vmatmul.mubr.bf16.gmra.mrb[92].mxu1 %v848_v35 }
 0x175   : > { %1273 = vmatmul.mubr.bf16.gmra.mrb[92].mxu0 %v848_v35  ;;  %1587 = vmatprep.mubr.bf16.mxu1 %v851_v36 }
 0x176   : > { %1282 = vmatprep.mubr.bf16.mxu0 %v851_v36 }
 0x17c   : > { %1588 = vmatmul.mubr.bf16.gmra.mrb[96].mxu1 %v850_v41 }
 0x17d   : > { %1283 = vmatmul.mubr.bf16.gmra.mrb[96].mxu0 %v850_v41  ;;  %1595 = vmatprep.mubr.bf16.mxu1 %v853_v42  ;;  %v792_v41 = vld [vmem:[#allocation3 + $0x3b0] sm:$0xff] }
 0x17e   : > { %1292 = vmatprep.mubr.bf16.mxu0 %v853_v42  ;;  %v795_v42 = vld [vmem:[#allocation3 + $0x3c8] sm:$0xff]  ;;  %v860_v50 = vpack.c.bf16 %v792_v41, %v790_v40 }
 0x17f   : > { %v863_v54 = vpack.c.bf16 %v797_v43, %v795_v42 }
 0x184   : > { %1596 = vmatmul.mubr.bf16.gmra.mrb[100].mxu1 %v852_v47 }
 0x185   : > { %1293 = vmatmul.mubr.bf16.gmra.mrb[100].mxu0 %v852_v47  ;;  %1603 = vmatprep.mubr.bf16.mxu1 %v855_v49 }
 0x186   : > { %1302 = vmatprep.mubr.bf16.mxu0 %v855_v49 }
 0x18c   : > { %1604 = vmatmul.mubr.bf16.gmra.mrb[104].mxu1 %v854_v55 }
 0x18d   : > { %1303 = vmatmul.mubr.bf16.gmra.mrb[104].mxu0 %v854_v55  ;;  %1611 = vmatprep.mubr.bf16.mxu1 %v857_v60 }
 0x18e   : > { %1312 = vmatprep.mubr.bf16.mxu0 %v857_v60  ;;  %v794_v60 = vld [vmem:[#allocation3 + $0x3c0] sm:$0xff] }
 0x18f   : > { %v1397_v5 = vpop.f32.mrb[0].mxu1 }
 0x190   : > { %v1044_v6 = vpop.f32.mrb[0].mxu0  ;;  %v2250_v7 = vadd.f32 %v3410_v61, %v1397_v5  ;;  %v1399_v9 = vpop.f32.mrb[1].mxu1 }
 0x191   : > { %v2248_v8 = vadd.f32 %v3412_v62, %v1044_v6  ;;  %v1046_v10 = vpop.f32.mrb[1].mxu0  ;;  %v1400_v13 = vpop.f32.mrb[2].mxu1 }
 0x192   : > { %v2249_v12 = vadd.f32 %v3414_v63, %v1046_v10  ;;  %v1048_v14 = vpop.f32.mrb[2].mxu0  ;;  %2442 = vst [vmem:[%s3419_s8 + $0x10] sm:$0xff] %v2250_v7  ;;  %v2253_v16 = vadd.f32 %v3410_v61, %v1400_v13  ;;  %v1402_v18 = vpop.f32.mrb[3].mxu1  ;;  %v862_v10 = vpack.c.bf16 %v796_v1, %v794_v60 }
 0x193   : > { %2440 = vst [vmem:[%s3419_s8] sm:$0xff] %v2248_v8  ;;  %v2251_v17 = vadd.f32 %v3412_v62, %v1048_v14  ;;  %v1050_v19 = vpop.f32.mrb[3].mxu0  ;;  %v865_v14 = vpack.c.bf16 %v801_v3, %v799_v2 }
 0x194   : > { %2441 = vst [vmem:[%s3419_s8 + $0x8] sm:$0xff] %v2249_v12  ;;  %v2252_v20 = vadd.f32 %v3414_v63, %v1050_v19  ;;  %2445 = vst [vmem:[%s3419_s8 + $0x28] sm:$0xff] %v2253_v16  ;;  %1612 = vmatmul.mubr.bf16.gmra.mrb[108].mxu1 %v856_v11 }
 0x195   : > { %2443 = vst [vmem:[%s3419_s8 + $0x18] sm:$0xff] %v2251_v17  ;;  %1313 = vmatmul.mubr.bf16.gmra.mrb[108].mxu0 %v856_v11  ;;  %1619 = vmatprep.mubr.bf16.mxu1 %v859_v15 }
 0x196   : > { %2444 = vst [vmem:[%s3419_s8 + $0x20] sm:$0xff] %v2252_v20  ;;  %1322 = vmatprep.mubr.bf16.mxu0 %v859_v15  ;;  %v798_v20 = vld [vmem:[#allocation3 + $0x3e0] sm:$0xff] }
 0x197   : > { %v1405_v25 = vpop.f32.mrb[4].mxu1 }
 0x198   : > { %v1054_v26 = vpop.f32.mrb[4].mxu0  ;;  %v2256_v27 = vadd.f32 %v3410_v61, %v1405_v25  ;;  %v1407_v29 = vpop.f32.mrb[5].mxu1 }
 0x199   : > { %v2254_v28 = vadd.f32 %v3412_v62, %v1054_v26  ;;  %v1056_v30 = vpop.f32.mrb[5].mxu0  ;;  %v1408_v33 = vpop.f32.mrb[6].mxu1 }
 0x19a   : > { %v2255_v32 = vadd.f32 %v3414_v63, %v1056_v30  ;;  %v1058_v0 = vpop.f32.mrb[6].mxu0  ;;  %2448 = vst [vmem:[%s3419_s8 + $0x40] sm:$0xff] %v2256_v27  ;;  %v2259_v35 = vadd.f32 %v3410_v61, %v1408_v33  ;;  %v1410_v37 = vpop.f32.mrb[7].mxu1 }
 0x19b   : > { %2446 = vst [vmem:[%s3419_s8 + $0x30] sm:$0xff] %v2254_v28  ;;  %v2257_v36 = vadd.f32 %v3412_v62, %v1058_v0  ;;  %v1060_v38 = vpop.f32.mrb[7].mxu0  ;;  %v864_v28 = vpack.c.bf16 %v800_v21, %v798_v20 }
 0x19c   : > { %2447 = vst [vmem:[%s3419_s8 + $0x38] sm:$0xff] %v2255_v32  ;;  %v2258_v39 = vadd.f32 %v3414_v63, %v1060_v38  ;;  %2451 = vst [vmem:[%s3419_s8 + $0x58] sm:$0xff] %v2259_v35  ;;  %1620 = vmatmul.mubr.bf16.gmra.mrb[112].mxu1 %v858_v31 }
 0x19d   : > { %2449 = vst [vmem:[%s3419_s8 + $0x48] sm:$0xff] %v2257_v36  ;;  %1323 = vmatmul.mubr.bf16.gmra.mrb[112].mxu0 %v858_v31  ;;  %1627 = vmatprep.mubr.bf16.mxu1 %v861_v34 }
 0x19e   : > { %2450 = vst [vmem:[%s3419_s8 + $0x50] sm:$0xff] %v2258_v39  ;;  %1332 = vmatprep.mubr.bf16.mxu0 %v861_v34 }
 0x19f   : > { %v1413_v44 = vpop.f32.mrb[8].mxu1 }
 0x1a0   : > { %v1064_v45 = vpop.f32.mrb[8].mxu0  ;;  %v2262_v46 = vadd.f32 %v3410_v61, %v1413_v44  ;;  %v1415_v48 = vpop.f32.mrb[9].mxu1 }
 0x1a1   : > { %v2260_v47 = vadd.f32 %v3412_v62, %v1064_v45  ;;  %v1066_v49 = vpop.f32.mrb[9].mxu0  ;;  %v1416_v52 = vpop.f32.mrb[10].mxu1 }
 0x1a2   : > { %v2261_v51 = vadd.f32 %v3414_v63, %v1066_v49  ;;  %v1068_v53 = vpop.f32.mrb[10].mxu0  ;;  %2454 = vst [vmem:[%s3419_s8 + $0x70] sm:$0xff] %v2262_v46  ;;  %v2265_v55 = vadd.f32 %v3410_v61, %v1416_v52  ;;  %v1418_v57 = vpop.f32.mrb[11].mxu1 }
 0x1a3   : > { %2452 = vst [vmem:[%s3419_s8 + $0x60] sm:$0xff] %v2260_v47  ;;  %v2263_v56 = vadd.f32 %v3412_v62, %v1068_v53  ;;  %v1070_v58 = vpop.f32.mrb[11].mxu0 }
 0x1a4   : > { %2453 = vst [vmem:[%s3419_s8 + $0x68] sm:$0xff] %v2261_v51  ;;  %v2264_v59 = vadd.f32 %v3414_v63, %v1070_v58  ;;  %2457 = vst [vmem:[%s3419_s8 + $0x88] sm:$0xff] %v2265_v55  ;;  %1628 = vmatmul.mubr.bf16.gmra.mrb[116].mxu1 %v860_v50 }
 0x1a5   : > { %2455 = vst [vmem:[%s3419_s8 + $0x78] sm:$0xff] %v2263_v56  ;;  %1333 = vmatmul.mubr.bf16.gmra.mrb[116].mxu0 %v860_v50  ;;  %1635 = vmatprep.mubr.bf16.mxu1 %v863_v54 }
 0x1a6   : > { %2456 = vst [vmem:[%s3419_s8 + $0x80] sm:$0xff] %v2264_v59  ;;  %1342 = vmatprep.mubr.bf16.mxu0 %v863_v54 }
 0x1a7   : > { %v1421_v4 = vpop.f32.mrb[12].mxu1 }
 0x1a8   : > { %v1074_v5 = vpop.f32.mrb[12].mxu0  ;;  %v2268_v6 = vadd.f32 %v3410_v61, %v1421_v4  ;;  %v1423_v8 = vpop.f32.mrb[13].mxu1 }
 0x1a9   : > { %v2266_v7 = vadd.f32 %v3412_v62, %v1074_v5  ;;  %v1076_v9 = vpop.f32.mrb[13].mxu0  ;;  %v1424_v12 = vpop.f32.mrb[14].mxu1 }
 0x1aa   : > { %v2267_v11 = vadd.f32 %v3414_v63, %v1076_v9  ;;  %v1078_v13 = vpop.f32.mrb[14].mxu0  ;;  %2460 = vst [vmem:[%s3419_s8 + $0xa0] sm:$0xff] %v2268_v6  ;;  %v2271_v15 = vadd.f32 %v3410_v61, %v1424_v12  ;;  %v1426_v17 = vpop.f32.mrb[15].mxu1 }
 0x1ab   : > { %2458 = vst [vmem:[%s3419_s8 + $0x90] sm:$0xff] %v2266_v7  ;;  %v2269_v16 = vadd.f32 %v3412_v62, %v1078_v13  ;;  %v1080_v18 = vpop.f32.mrb[15].mxu0 }
 0x1ac   : > { %2459 = vst [vmem:[%s3419_s8 + $0x98] sm:$0xff] %v2267_v11  ;;  %v2270_v19 = vadd.f32 %v3414_v63, %v1080_v18  ;;  %2463 = vst [vmem:[%s3419_s8 + $0xb8] sm:$0xff] %v2271_v15  ;;  %1636 = vmatmul.mubr.bf16.gmra.mrb[120].mxu1 %v862_v10 }
 0x1ad   : > { %2461 = vst [vmem:[%s3419_s8 + $0xa8] sm:$0xff] %v2269_v16  ;;  %1343 = vmatmul.mubr.bf16.gmra.mrb[120].mxu0 %v862_v10  ;;  %1643 = vmatprep.mubr.bf16.mxu1 %v865_v14 }
 0x1ae   : > { %2462 = vst [vmem:[%s3419_s8 + $0xb0] sm:$0xff] %v2270_v19  ;;  %1352 = vmatprep.mubr.bf16.mxu0 %v865_v14 }
 0x1af   : > { %v1429_v22 = vpop.f32.mrb[16].mxu1 }
 0x1b0   : > { %v1084_v23 = vpop.f32.mrb[16].mxu0  ;;  %v2274_v24 = vadd.f32 %v3410_v61, %v1429_v22  ;;  %v1431_v26 = vpop.f32.mrb[17].mxu1 }
 0x1b1   : > { %v2272_v25 = vadd.f32 %v3412_v62, %v1084_v23  ;;  %v1086_v27 = vpop.f32.mrb[17].mxu0  ;;  %v1432_v30 = vpop.f32.mrb[18].mxu1 }
 0x1b2   : > { %v2273_v29 = vadd.f32 %v3414_v63, %v1086_v27  ;;  %v1088_v31 = vpop.f32.mrb[18].mxu0  ;;  %2466 = vst [vmem:[%s3419_s8 + $0xd0] sm:$0xff] %v2274_v24  ;;  %v2277_v32 = vadd.f32 %v3410_v61, %v1432_v30  ;;  %v1434_v0 = vpop.f32.mrb[19].mxu1 }
 0x1b3   : > { %2464 = vst [vmem:[%s3419_s8 + $0xc0] sm:$0xff] %v2272_v25  ;;  %v2275_v33 = vadd.f32 %v3412_v62, %v1088_v31  ;;  %v1090_v34 = vpop.f32.mrb[19].mxu0 }
 0x1b4   : > { %2465 = vst [vmem:[%s3419_s8 + $0xc8] sm:$0xff] %v2273_v29  ;;  %v2276_v35 = vadd.f32 %v3414_v63, %v1090_v34  ;;  %2469 = vst [vmem:[%s3419_s8 + $0xe8] sm:$0xff] %v2277_v32  ;;  %1644 = vmatmul.mubr.bf16.gmra.mrb[124].mxu1 %v864_v28 }
 0x1b5   : > { %2467 = vst [vmem:[%s3419_s8 + $0xd8] sm:$0xff] %v2275_v33  ;;  %1353 = vmatmul.mubr.bf16.gmra.mrb[124].mxu0 %v864_v28 }
 0x1b6   : > { %2468 = vst [vmem:[%s3419_s8 + $0xe0] sm:$0xff] %v2276_v35 }
 0x1b7   : > { %v1437_v36 = vpop.f32.mrb[20].mxu1 }
 0x1b8   : > { %v1094_v37 = vpop.f32.mrb[20].mxu0  ;;  %v2280_v38 = vadd.f32 %v3410_v61, %v1437_v36  ;;  %v1439_v40 = vpop.f32.mrb[21].mxu1 }
 0x1b9   : > { %v2278_v39 = vadd.f32 %v3412_v62, %v1094_v37  ;;  %v1096_v41 = vpop.f32.mrb[21].mxu0  ;;  %v1440_v43 = vpop.f32.mrb[22].mxu1 }
 0x1ba   : > { %v2279_v42 = vadd.f32 %v3414_v63, %v1096_v41  ;;  %v1098_v44 = vpop.f32.mrb[22].mxu0  ;;  %2472 = vst [vmem:[%s3419_s8 + $0x100] sm:$0xff] %v2280_v38  ;;  %v2283_v45 = vadd.f32 %v3410_v61, %v1440_v43  ;;  %v1442_v47 = vpop.f32.mrb[23].mxu1 }
 0x1bb   : > { %2470 = vst [vmem:[%s3419_s8 + $0xf0] sm:$0xff] %v2278_v39  ;;  %v2281_v46 = vadd.f32 %v3412_v62, %v1098_v44  ;;  %v1100_v48 = vpop.f32.mrb[23].mxu0 }
 0x1bc   : > { %2471 = vst [vmem:[%s3419_s8 + $0xf8] sm:$0xff] %v2279_v42  ;;  %v2282_v49 = vadd.f32 %v3414_v63, %v1100_v48  ;;  %2475 = vst [vmem:[%s3419_s8 + $0x118] sm:$0xff] %v2283_v45 }
 0x1bd   : > { %2473 = vst [vmem:[%s3419_s8 + $0x108] sm:$0xff] %v2281_v46 }
 0x1be   : > { %2474 = vst [vmem:[%s3419_s8 + $0x110] sm:$0xff] %v2282_v49 }
 0x1bf   : > { %v1445_v50 = vpop.f32.mrb[24].mxu1 }
 0x1c0   : > { %v1104_v51 = vpop.f32.mrb[24].mxu0  ;;  %v2286_v52 = vadd.f32 %v3410_v61, %v1445_v50  ;;  %v1447_v54 = vpop.f32.mrb[25].mxu1 }
 0x1c1   : > { %v2284_v53 = vadd.f32 %v3412_v62, %v1104_v51  ;;  %v1106_v55 = vpop.f32.mrb[25].mxu0  ;;  %v1448_v57 = vpop.f32.mrb[26].mxu1 }
 0x1c2   : > { %v2285_v56 = vadd.f32 %v3414_v63, %v1106_v55  ;;  %v1108_v58 = vpop.f32.mrb[26].mxu0  ;;  %2478 = vst [vmem:[%s3419_s8 + $0x130] sm:$0xff] %v2286_v52  ;;  %v2289_v59 = vadd.f32 %v3410_v61, %v1448_v57  ;;  %v1450_v1 = vpop.f32.mrb[27].mxu1 }
 0x1c3   : > { %2476 = vst [vmem:[%s3419_s8 + $0x120] sm:$0xff] %v2284_v53  ;;  %v2287_v60 = vadd.f32 %v3412_v62, %v1108_v58  ;;  %v1110_v2 = vpop.f32.mrb[27].mxu0 }
 0x1c4   : > { %2477 = vst [vmem:[%s3419_s8 + $0x128] sm:$0xff] %v2285_v56  ;;  %v2288_v3 = vadd.f32 %v3414_v63, %v1110_v2  ;;  %2481 = vst [vmem:[%s3419_s8 + $0x148] sm:$0xff] %v2289_v59 }
 0x1c5   : > { %2479 = vst [vmem:[%s3419_s8 + $0x138] sm:$0xff] %v2287_v60 }
 0x1c6   : > { %2480 = vst [vmem:[%s3419_s8 + $0x140] sm:$0xff] %v2288_v3 }
 0x1c7   : > { %v1453_v4 = vpop.f32.mrb[28].mxu1 }
 0x1c8   : > { %v1114_v5 = vpop.f32.mrb[28].mxu0  ;;  %v2292_v6 = vadd.f32 %v3410_v61, %v1453_v4  ;;  %v1455_v8 = vpop.f32.mrb[29].mxu1 }
 0x1c9   : > { %v2290_v7 = vadd.f32 %v3412_v62, %v1114_v5  ;;  %v1116_v9 = vpop.f32.mrb[29].mxu0  ;;  %v1456_v11 = vpop.f32.mrb[30].mxu1 }
 0x1ca   : > { %v2291_v10 = vadd.f32 %v3414_v63, %v1116_v9  ;;  %v1118_v12 = vpop.f32.mrb[30].mxu0  ;;  %2484 = vst [vmem:[%s3419_s8 + $0x160] sm:$0xff] %v2292_v6  ;;  %v2295_v13 = vadd.f32 %v3410_v61, %v1456_v11  ;;  %v1458_v15 = vpop.f32.mrb[31].mxu1 }
 0x1cb   : > { %2482 = vst [vmem:[%s3419_s8 + $0x150] sm:$0xff] %v2290_v7  ;;  %v2293_v14 = vadd.f32 %v3412_v62, %v1118_v12  ;;  %v1120_v16 = vpop.f32.mrb[31].mxu0 }
 0x1cc   : > { %2483 = vst [vmem:[%s3419_s8 + $0x158] sm:$0xff] %v2291_v10  ;;  %v2294_v17 = vadd.f32 %v3414_v63, %v1120_v16  ;;  %2487 = vst [vmem:[%s3419_s8 + $0x178] sm:$0xff] %v2295_v13 }
 0x1cd   : > { %2485 = vst [vmem:[%s3419_s8 + $0x168] sm:$0xff] %v2293_v14 }
 0x1ce   : > { %2486 = vst [vmem:[%s3419_s8 + $0x170] sm:$0xff] %v2294_v17 }
 0x1cf   : > { %v1461_v18 = vpop.f32.mrb[32].mxu1 }
 0x1d0   : > { %v1124_v19 = vpop.f32.mrb[32].mxu0  ;;  %v2298_v20 = vadd.f32 %v3410_v61, %v1461_v18  ;;  %v1463_v22 = vpop.f32.mrb[33].mxu1 }
 0x1d1   : > { %v2296_v21 = vadd.f32 %v3412_v62, %v1124_v19  ;;  %v1126_v23 = vpop.f32.mrb[33].mxu0  ;;  %v1464_v25 = vpop.f32.mrb[34].mxu1 }
 0x1d2   : > { %v2297_v24 = vadd.f32 %v3414_v63, %v1126_v23  ;;  %v1128_v26 = vpop.f32.mrb[34].mxu0  ;;  %2490 = vst [vmem:[%s3419_s8 + $0x190] sm:$0xff] %v2298_v20  ;;  %v2301_v27 = vadd.f32 %v3410_v61, %v1464_v25  ;;  %v1466_v29 = vpop.f32.mrb[35].mxu1 }
 0x1d3   : > { %2488 = vst [vmem:[%s3419_s8 + $0x180] sm:$0xff] %v2296_v21  ;;  %v2299_v28 = vadd.f32 %v3412_v62, %v1128_v26  ;;  %v1130_v30 = vpop.f32.mrb[35].mxu0 }
 0x1d4   : > { %2489 = vst [vmem:[%s3419_s8 + $0x188] sm:$0xff] %v2297_v24  ;;  %v2300_v31 = vadd.f32 %v3414_v63, %v1130_v30  ;;  %2493 = vst [vmem:[%s3419_s8 + $0x1a8] sm:$0xff] %v2301_v27 }
 0x1d5   : > { %2491 = vst [vmem:[%s3419_s8 + $0x198] sm:$0xff] %v2299_v28 }
 0x1d6   : > { %2492 = vst [vmem:[%s3419_s8 + $0x1a0] sm:$0xff] %v2300_v31 }
 0x1d7   : > { %v1469_v32 = vpop.f32.mrb[36].mxu1 }
 0x1d8   : > { %v1134_v33 = vpop.f32.mrb[36].mxu0  ;;  %v2304_v0 = vadd.f32 %v3410_v61, %v1469_v32  ;;  %v1471_v35 = vpop.f32.mrb[37].mxu1 }
 0x1d9   : > { %v2302_v34 = vadd.f32 %v3412_v62, %v1134_v33  ;;  %v1136_v36 = vpop.f32.mrb[37].mxu0  ;;  %v1472_v38 = vpop.f32.mrb[38].mxu1 }
 0x1da   : > { %v2303_v37 = vadd.f32 %v3414_v63, %v1136_v36  ;;  %v1138_v39 = vpop.f32.mrb[38].mxu0  ;;  %2496 = vst [vmem:[%s3419_s8 + $0x1c0] sm:$0xff] %v2304_v0  ;;  %v2307_v40 = vadd.f32 %v3410_v61, %v1472_v38  ;;  %v1474_v42 = vpop.f32.mrb[39].mxu1 }
 0x1db   : > { %2494 = vst [vmem:[%s3419_s8 + $0x1b0] sm:$0xff] %v2302_v34  ;;  %v2305_v41 = vadd.f32 %v3412_v62, %v1138_v39  ;;  %v1140_v43 = vpop.f32.mrb[39].mxu0 }
 0x1dc   : > { %2495 = vst [vmem:[%s3419_s8 + $0x1b8] sm:$0xff] %v2303_v37  ;;  %v2306_v44 = vadd.f32 %v3414_v63, %v1140_v43  ;;  %2499 = vst [vmem:[%s3419_s8 + $0x1d8] sm:$0xff] %v2307_v40 }
 0x1dd   : > { %2497 = vst [vmem:[%s3419_s8 + $0x1c8] sm:$0xff] %v2305_v41 }
 0x1de   : > { %2498 = vst [vmem:[%s3419_s8 + $0x1d0] sm:$0xff] %v2306_v44 }
 0x1df   : > { %v1477_v45 = vpop.f32.mrb[40].mxu1 }
 0x1e0   : > { %v1144_v46 = vpop.f32.mrb[40].mxu0  ;;  %v2310_v47 = vadd.f32 %v3410_v61, %v1477_v45  ;;  %v1479_v49 = vpop.f32.mrb[41].mxu1 }
 0x1e1   : > { %v2308_v48 = vadd.f32 %v3412_v62, %v1144_v46  ;;  %v1146_v50 = vpop.f32.mrb[41].mxu0  ;;  %v1480_v52 = vpop.f32.mrb[42].mxu1 }
 0x1e2   : > { %v2309_v51 = vadd.f32 %v3414_v63, %v1146_v50  ;;  %v1148_v53 = vpop.f32.mrb[42].mxu0  ;;  %2502 = vst [vmem:[%s3419_s8 + $0x1f0] sm:$0xff] %v2310_v47  ;;  %v2313_v54 = vadd.f32 %v3410_v61, %v1480_v52  ;;  %v1482_v56 = vpop.f32.mrb[43].mxu1 }
 0x1e3   : > { %2500 = vst [vmem:[%s3419_s8 + $0x1e0] sm:$0xff] %v2308_v48  ;;  %v2311_v55 = vadd.f32 %v3412_v62, %v1148_v53  ;;  %v1150_v57 = vpop.f32.mrb[43].mxu0 }
 0x1e4   : > { %2501 = vst [vmem:[%s3419_s8 + $0x1e8] sm:$0xff] %v2309_v51  ;;  %v2312_v58 = vadd.f32 %v3414_v63, %v1150_v57  ;;  %2505 = vst [vmem:[%s3419_s8 + $0x208] sm:$0xff] %v2313_v54 }
 0x1e5   : > { %2503 = vst [vmem:[%s3419_s8 + $0x1f8] sm:$0xff] %v2311_v55 }
 0x1e6   : > { %2504 = vst [vmem:[%s3419_s8 + $0x200] sm:$0xff] %v2312_v58 }
 0x1e7   : > { %v1485_v59 = vpop.f32.mrb[44].mxu1 }
 0x1e8   : > { %v1154_v60 = vpop.f32.mrb[44].mxu0  ;;  %v2316_v1 = vadd.f32 %v3410_v61, %v1485_v59  ;;  %v1487_v3 = vpop.f32.mrb[45].mxu1 }
 0x1e9   : > { %v2314_v2 = vadd.f32 %v3412_v62, %v1154_v60  ;;  %v1156_v4 = vpop.f32.mrb[45].mxu0  ;;  %v1488_v6 = vpop.f32.mrb[46].mxu1 }
 0x1ea   : > { %v2315_v5 = vadd.f32 %v3414_v63, %v1156_v4  ;;  %v1158_v7 = vpop.f32.mrb[46].mxu0  ;;  %2508 = vst [vmem:[%s3419_s8 + $0x220] sm:$0xff] %v2316_v1  ;;  %v2319_v8 = vadd.f32 %v3410_v61, %v1488_v6  ;;  %v1490_v10 = vpop.f32.mrb[47].mxu1 }
 0x1eb   : > { %2506 = vst [vmem:[%s3419_s8 + $0x210] sm:$0xff] %v2314_v2  ;;  %v2317_v9 = vadd.f32 %v3412_v62, %v1158_v7  ;;  %v1160_v11 = vpop.f32.mrb[47].mxu0 }
 0x1ec   : > { %2507 = vst [vmem:[%s3419_s8 + $0x218] sm:$0xff] %v2315_v5  ;;  %v2318_v12 = vadd.f32 %v3414_v63, %v1160_v11  ;;  %2511 = vst [vmem:[%s3419_s8 + $0x238] sm:$0xff] %v2319_v8 }
 0x1ed   : > { %2509 = vst [vmem:[%s3419_s8 + $0x228] sm:$0xff] %v2317_v9 }
 0x1ee   : > { %2510 = vst [vmem:[%s3419_s8 + $0x230] sm:$0xff] %v2318_v12 }
 0x1ef   : > { %v1493_v13 = vpop.f32.mrb[48].mxu1 }
 0x1f0   : > { %v1164_v14 = vpop.f32.mrb[48].mxu0  ;;  %v2322_v15 = vadd.f32 %v3410_v61, %v1493_v13  ;;  %v1495_v17 = vpop.f32.mrb[49].mxu1 }
 0x1f1   : > { %v2320_v16 = vadd.f32 %v3412_v62, %v1164_v14  ;;  %v1166_v18 = vpop.f32.mrb[49].mxu0  ;;  %v1496_v20 = vpop.f32.mrb[50].mxu1 }
 0x1f2   : > { %v2321_v19 = vadd.f32 %v3414_v63, %v1166_v18  ;;  %v1168_v21 = vpop.f32.mrb[50].mxu0  ;;  %2514 = vst [vmem:[%s3419_s8 + $0x250] sm:$0xff] %v2322_v15  ;;  %v2325_v22 = vadd.f32 %v3410_v61, %v1496_v20  ;;  %v1498_v24 = vpop.f32.mrb[51].mxu1 }
 0x1f3   : > { %2512 = vst [vmem:[%s3419_s8 + $0x240] sm:$0xff] %v2320_v16  ;;  %v2323_v23 = vadd.f32 %v3412_v62, %v1168_v21  ;;  %v1170_v25 = vpop.f32.mrb[51].mxu0 }
 0x1f4   : > { %2513 = vst [vmem:[%s3419_s8 + $0x248] sm:$0xff] %v2321_v19  ;;  %v2324_v26 = vadd.f32 %v3414_v63, %v1170_v25  ;;  %2517 = vst [vmem:[%s3419_s8 + $0x268] sm:$0xff] %v2325_v22 }
 0x1f5   : > { %2515 = vst [vmem:[%s3419_s8 + $0x258] sm:$0xff] %v2323_v23 }
 0x1f6   : > { %2516 = vst [vmem:[%s3419_s8 + $0x260] sm:$0xff] %v2324_v26 }
 0x1f7   : > { %v1501_v27 = vpop.f32.mrb[52].mxu1 }
 0x1f8   : > { %v1174_v28 = vpop.f32.mrb[52].mxu0  ;;  %v2328_v29 = vadd.f32 %v3410_v61, %v1501_v27  ;;  %v1503_v31 = vpop.f32.mrb[53].mxu1 }
 0x1f9   : > { %v2326_v30 = vadd.f32 %v3412_v62, %v1174_v28  ;;  %v1176_v32 = vpop.f32.mrb[53].mxu0  ;;  %v1504_v0 = vpop.f32.mrb[54].mxu1 }
 0x1fa   : > { %v2327_v33 = vadd.f32 %v3414_v63, %v1176_v32  ;;  %v1178_v34 = vpop.f32.mrb[54].mxu0  ;;  %2520 = vst [vmem:[%s3419_s8 + $0x280] sm:$0xff] %v2328_v29  ;;  %v2331_v35 = vadd.f32 %v3410_v61, %v1504_v0  ;;  %v1506_v37 = vpop.f32.mrb[55].mxu1 }
 0x1fb   : > { %2518 = vst [vmem:[%s3419_s8 + $0x270] sm:$0xff] %v2326_v30  ;;  %v2329_v36 = vadd.f32 %v3412_v62, %v1178_v34  ;;  %v1180_v38 = vpop.f32.mrb[55].mxu0 }
 0x1fc   : > { %2519 = vst [vmem:[%s3419_s8 + $0x278] sm:$0xff] %v2327_v33  ;;  %v2330_v39 = vadd.f32 %v3414_v63, %v1180_v38  ;;  %2523 = vst [vmem:[%s3419_s8 + $0x298] sm:$0xff] %v2331_v35 }
 0x1fd   : > { %2521 = vst [vmem:[%s3419_s8 + $0x288] sm:$0xff] %v2329_v36 }
 0x1fe   : > { %2522 = vst [vmem:[%s3419_s8 + $0x290] sm:$0xff] %v2330_v39 }
 0x1ff   : > { %v1509_v40 = vpop.f32.mrb[56].mxu1 }
 0x200   : > { %v1184_v41 = vpop.f32.mrb[56].mxu0  ;;  %v2334_v42 = vadd.f32 %v3410_v61, %v1509_v40  ;;  %v1511_v44 = vpop.f32.mrb[57].mxu1 }
 0x201   : > { %v2332_v43 = vadd.f32 %v3412_v62, %v1184_v41  ;;  %v1186_v45 = vpop.f32.mrb[57].mxu0  ;;  %v1512_v47 = vpop.f32.mrb[58].mxu1 }
 0x202   : > { %v2333_v46 = vadd.f32 %v3414_v63, %v1186_v45  ;;  %v1188_v48 = vpop.f32.mrb[58].mxu0  ;;  %2526 = vst [vmem:[%s3419_s8 + $0x2b0] sm:$0xff] %v2334_v42  ;;  %v2337_v49 = vadd.f32 %v3410_v61, %v1512_v47  ;;  %v1514_v51 = vpop.f32.mrb[59].mxu1 }
 0x203   : > { %2524 = vst [vmem:[%s3419_s8 + $0x2a0] sm:$0xff] %v2332_v43  ;;  %v2335_v50 = vadd.f32 %v3412_v62, %v1188_v48  ;;  %v1190_v52 = vpop.f32.mrb[59].mxu0 }
 0x204   : > { %2525 = vst [vmem:[%s3419_s8 + $0x2a8] sm:$0xff] %v2333_v46  ;;  %v2336_v53 = vadd.f32 %v3414_v63, %v1190_v52  ;;  %2529 = vst [vmem:[%s3419_s8 + $0x2c8] sm:$0xff] %v2337_v49 }
 0x205   : > { %2527 = vst [vmem:[%s3419_s8 + $0x2b8] sm:$0xff] %v2335_v50 }
 0x206   : > { %2528 = vst [vmem:[%s3419_s8 + $0x2c0] sm:$0xff] %v2336_v53 }
 0x207   : > { %v1517_v54 = vpop.f32.mrb[60].mxu1 }
 0x208   : > { %v1194_v55 = vpop.f32.mrb[60].mxu0  ;;  %v2340_v56 = vadd.f32 %v3410_v61, %v1517_v54  ;;  %v1519_v58 = vpop.f32.mrb[61].mxu1 }
 0x209   : > { %v2338_v57 = vadd.f32 %v3412_v62, %v1194_v55  ;;  %v1196_v59 = vpop.f32.mrb[61].mxu0  ;;  %v1520_v1 = vpop.f32.mrb[62].mxu1 }
 0x20a   : > { %v2339_v60 = vadd.f32 %v3414_v63, %v1196_v59  ;;  %v1198_v2 = vpop.f32.mrb[62].mxu0  ;;  %2532 = vst [vmem:[%s3419_s8 + $0x2e0] sm:$0xff] %v2340_v56  ;;  %v2343_v3 = vadd.f32 %v3410_v61, %v1520_v1  ;;  %v1522_v5 = vpop.f32.mrb[63].mxu1 }
 0x20b   : > { %2530 = vst [vmem:[%s3419_s8 + $0x2d0] sm:$0xff] %v2338_v57  ;;  %v2341_v4 = vadd.f32 %v3412_v62, %v1198_v2  ;;  %v1200_v6 = vpop.f32.mrb[63].mxu0 }
 0x20c   : > { %2531 = vst [vmem:[%s3419_s8 + $0x2d8] sm:$0xff] %v2339_v60  ;;  %v2342_v7 = vadd.f32 %v3414_v63, %v1200_v6  ;;  %2535 = vst [vmem:[%s3419_s8 + $0x2f8] sm:$0xff] %v2343_v3 }
 0x20d   : > { %2533 = vst [vmem:[%s3419_s8 + $0x2e8] sm:$0xff] %v2341_v4 }
 0x20e   : > { %2534 = vst [vmem:[%s3419_s8 + $0x2f0] sm:$0xff] %v2342_v7 }
 0x20f   : > { %v1525_v8 = vpop.f32.mrb[64].mxu1 }
 0x210   : > { %v1204_v9 = vpop.f32.mrb[64].mxu0  ;;  %v2346_v10 = vadd.f32 %v3410_v61, %v1525_v8  ;;  %v1527_v12 = vpop.f32.mrb[65].mxu1 }
 0x211   : > { %v2344_v11 = vadd.f32 %v3412_v62, %v1204_v9  ;;  %v1206_v13 = vpop.f32.mrb[65].mxu0  ;;  %v1528_v15 = vpop.f32.mrb[66].mxu1 }
 0x212   : > { %v2345_v14 = vadd.f32 %v3414_v63, %v1206_v13  ;;  %v1208_v16 = vpop.f32.mrb[66].mxu0  ;;  %2538 = vst [vmem:[%s3419_s8 + $0x310] sm:$0xff] %v2346_v10  ;;  %v2349_v17 = vadd.f32 %v3410_v61, %v1528_v15  ;;  %v1530_v19 = vpop.f32.mrb[67].mxu1 }
 0x213   : > { %2536 = vst [vmem:[%s3419_s8 + $0x300] sm:$0xff] %v2344_v11  ;;  %v2347_v18 = vadd.f32 %v3412_v62, %v1208_v16  ;;  %v1210_v20 = vpop.f32.mrb[67].mxu0 }
 0x214   : > { %2537 = vst [vmem:[%s3419_s8 + $0x308] sm:$0xff] %v2345_v14  ;;  %v2348_v21 = vadd.f32 %v3414_v63, %v1210_v20  ;;  %2541 = vst [vmem:[%s3419_s8 + $0x328] sm:$0xff] %v2349_v17 }
 0x215   : > { %2539 = vst [vmem:[%s3419_s8 + $0x318] sm:$0xff] %v2347_v18 }
 0x216   : > { %2540 = vst [vmem:[%s3419_s8 + $0x320] sm:$0xff] %v2348_v21 }
 0x217   : > { %v1533_v22 = vpop.f32.mrb[68].mxu1 }
 0x218   : > { %v1214_v23 = vpop.f32.mrb[68].mxu0  ;;  %v2352_v24 = vadd.f32 %v3410_v61, %v1533_v22  ;;  %v1535_v26 = vpop.f32.mrb[69].mxu1 }
 0x219   : > { %v2350_v25 = vadd.f32 %v3412_v62, %v1214_v23  ;;  %v1216_v27 = vpop.f32.mrb[69].mxu0  ;;  %v1536_v29 = vpop.f32.mrb[70].mxu1 }
 0x21a   : > { %v2351_v28 = vadd.f32 %v3414_v63, %v1216_v27  ;;  %v1218_v30 = vpop.f32.mrb[70].mxu0  ;;  %2544 = vst [vmem:[%s3419_s8 + $0x340] sm:$0xff] %v2352_v24  ;;  %v2355_v31 = vadd.f32 %v3410_v61, %v1536_v29  ;;  %v1538_v33 = vpop.f32.mrb[71].mxu1 }
 0x21b   : > { %2542 = vst [vmem:[%s3419_s8 + $0x330] sm:$0xff] %v2350_v25  ;;  %v2353_v32 = vadd.f32 %v3412_v62, %v1218_v30  ;;  %v1220_v0 = vpop.f32.mrb[71].mxu0 }
 0x21c   : > { %2543 = vst [vmem:[%s3419_s8 + $0x338] sm:$0xff] %v2351_v28  ;;  %v2354_v34 = vadd.f32 %v3414_v63, %v1220_v0  ;;  %2547 = vst [vmem:[%s3419_s8 + $0x358] sm:$0xff] %v2355_v31 }
 0x21d   : > { %2545 = vst [vmem:[%s3419_s8 + $0x348] sm:$0xff] %v2353_v32 }
 0x21e   : > { %2546 = vst [vmem:[%s3419_s8 + $0x350] sm:$0xff] %v2354_v34 }
 0x21f   : > { %v1541_v35 = vpop.f32.mrb[72].mxu1 }
 0x220   : > { %v1224_v36 = vpop.f32.mrb[72].mxu0  ;;  %v2358_v37 = vadd.f32 %v3410_v61, %v1541_v35  ;;  %v1543_v39 = vpop.f32.mrb[73].mxu1 }
 0x221   : > { %v2356_v38 = vadd.f32 %v3412_v62, %v1224_v36  ;;  %v1226_v40 = vpop.f32.mrb[73].mxu0  ;;  %v1544_v42 = vpop.f32.mrb[74].mxu1 }
 0x222   : > { %v2357_v41 = vadd.f32 %v3414_v63, %v1226_v40  ;;  %v1228_v43 = vpop.f32.mrb[74].mxu0  ;;  %2550 = vst [vmem:[%s3419_s8 + $0x370] sm:$0xff] %v2358_v37  ;;  %v2361_v44 = vadd.f32 %v3410_v61, %v1544_v42  ;;  %v1546_v46 = vpop.f32.mrb[75].mxu1 }
 0x223   : > { %2548 = vst [vmem:[%s3419_s8 + $0x360] sm:$0xff] %v2356_v38  ;;  %v2359_v45 = vadd.f32 %v3412_v62, %v1228_v43  ;;  %v1230_v47 = vpop.f32.mrb[75].mxu0 }
 0x224   : > { %2549 = vst [vmem:[%s3419_s8 + $0x368] sm:$0xff] %v2357_v41  ;;  %v2360_v48 = vadd.f32 %v3414_v63, %v1230_v47  ;;  %2553 = vst [vmem:[%s3419_s8 + $0x388] sm:$0xff] %v2361_v44 }
 0x225   : > { %2551 = vst [vmem:[%s3419_s8 + $0x378] sm:$0xff] %v2359_v45 }
 0x226   : > { %2552 = vst [vmem:[%s3419_s8 + $0x380] sm:$0xff] %v2360_v48 }
 0x227   : > { %v1549_v49 = vpop.f32.mrb[76].mxu1 }
 0x228   : > { %v1234_v50 = vpop.f32.mrb[76].mxu0  ;;  %v2364_v51 = vadd.f32 %v3410_v61, %v1549_v49  ;;  %v1551_v53 = vpop.f32.mrb[77].mxu1 }
 0x229   : > { %v2362_v52 = vadd.f32 %v3412_v62, %v1234_v50  ;;  %v1236_v54 = vpop.f32.mrb[77].mxu0  ;;  %v1552_v56 = vpop.f32.mrb[78].mxu1 }
 0x22a   : > { %v2363_v55 = vadd.f32 %v3414_v63, %v1236_v54  ;;  %v1238_v57 = vpop.f32.mrb[78].mxu0  ;;  %2556 = vst [vmem:[%s3419_s8 + $0x3a0] sm:$0xff] %v2364_v51  ;;  %v2367_v58 = vadd.f32 %v3410_v61, %v1552_v56  ;;  %v1554_v60 = vpop.f32.mrb[79].mxu1 }
 0x22b   : > { %2554 = vst [vmem:[%s3419_s8 + $0x390] sm:$0xff] %v2362_v52  ;;  %v2365_v59 = vadd.f32 %v3412_v62, %v1238_v57  ;;  %v1240_v1 = vpop.f32.mrb[79].mxu0 }
 0x22c   : > { %2555 = vst [vmem:[%s3419_s8 + $0x398] sm:$0xff] %v2363_v55  ;;  %v2366_v2 = vadd.f32 %v3414_v63, %v1240_v1  ;;  %2559 = vst [vmem:[%s3419_s8 + $0x3b8] sm:$0xff] %v2367_v58 }
 0x22d   : > { %2557 = vst [vmem:[%s3419_s8 + $0x3a8] sm:$0xff] %v2365_v59 }
 0x22e   : > { %2558 = vst [vmem:[%s3419_s8 + $0x3b0] sm:$0xff] %v2366_v2 }
 0x22f   : > { %v1557_v3 = vpop.f32.mrb[80].mxu1 }
 0x230   : > { %v1244_v4 = vpop.f32.mrb[80].mxu0  ;;  %v2370_v5 = vadd.f32 %v3410_v61, %v1557_v3  ;;  %v1559_v7 = vpop.f32.mrb[81].mxu1 }
 0x231   : > { %v2368_v6 = vadd.f32 %v3412_v62, %v1244_v4  ;;  %v1246_v8 = vpop.f32.mrb[81].mxu0  ;;  %v1560_v10 = vpop.f32.mrb[82].mxu1 }
 0x232   : > { %v2369_v9 = vadd.f32 %v3414_v63, %v1246_v8  ;;  %v1248_v11 = vpop.f32.mrb[82].mxu0  ;;  %2562 = vst [vmem:[%s3419_s8 + $0x3d0] sm:$0xff] %v2370_v5  ;;  %v2373_v12 = vadd.f32 %v3410_v61, %v1560_v10  ;;  %v1562_v14 = vpop.f32.mrb[83].mxu1 }
 0x233   : > { %2560 = vst [vmem:[%s3419_s8 + $0x3c0] sm:$0xff] %v2368_v6  ;;  %v2371_v13 = vadd.f32 %v3412_v62, %v1248_v11  ;;  %v1250_v15 = vpop.f32.mrb[83].mxu0 }
 0x234   : > { %2561 = vst [vmem:[%s3419_s8 + $0x3c8] sm:$0xff] %v2369_v9  ;;  %v2372_v16 = vadd.f32 %v3414_v63, %v1250_v15  ;;  %2565 = vst [vmem:[%s3419_s8 + $0x3e8] sm:$0xff] %v2373_v12 }
 0x235   : > { %2563 = vst [vmem:[%s3419_s8 + $0x3d8] sm:$0xff] %v2371_v13 }
 0x236   : > { %2564 = vst [vmem:[%s3419_s8 + $0x3e0] sm:$0xff] %v2372_v16 }
 0x237   : > { %v1565_v17 = vpop.f32.mrb[84].mxu1 }
 0x238   : > { %v1254_v18 = vpop.f32.mrb[84].mxu0  ;;  %v2376_v19 = vadd.f32 %v3410_v61, %v1565_v17  ;;  %v1567_v21 = vpop.f32.mrb[85].mxu1 }
 0x239   : > { %v2374_v20 = vadd.f32 %v3412_v62, %v1254_v18  ;;  %v1256_v22 = vpop.f32.mrb[85].mxu0  ;;  %v1568_v24 = vpop.f32.mrb[86].mxu1 }
 0x23a   : > { %v2375_v23 = vadd.f32 %v3414_v63, %v1256_v22  ;;  %v1258_v25 = vpop.f32.mrb[86].mxu0  ;;  %2568 = vst [vmem:[%s3419_s8 + $0x400] sm:$0xff] %v2376_v19  ;;  %v2379_v26 = vadd.f32 %v3410_v61, %v1568_v24  ;;  %v1570_v28 = vpop.f32.mrb[87].mxu1 }
 0x23b   : > { %2566 = vst [vmem:[%s3419_s8 + $0x3f0] sm:$0xff] %v2374_v20  ;;  %v2377_v27 = vadd.f32 %v3412_v62, %v1258_v25  ;;  %v1260_v29 = vpop.f32.mrb[87].mxu0 }
 0x23c   : > { %2567 = vst [vmem:[%s3419_s8 + $0x3f8] sm:$0xff] %v2375_v23  ;;  %v2378_v30 = vadd.f32 %v3414_v63, %v1260_v29  ;;  %2571 = vst [vmem:[%s3419_s8 + $0x418] sm:$0xff] %v2379_v26 }
 0x23d   : > { %2569 = vst [vmem:[%s3419_s8 + $0x408] sm:$0xff] %v2377_v27 }
 0x23e   : > { %2570 = vst [vmem:[%s3419_s8 + $0x410] sm:$0xff] %v2378_v30 }
 0x23f   : > { %v1573_v31 = vpop.f32.mrb[88].mxu1 }
 0x240   : > { %v1264_v32 = vpop.f32.mrb[88].mxu0  ;;  %v2382_v33 = vadd.f32 %v3410_v61, %v1573_v31  ;;  %v1575_v34 = vpop.f32.mrb[89].mxu1 }
 0x241   : > { %v2380_v0 = vadd.f32 %v3412_v62, %v1264_v32  ;;  %v1266_v35 = vpop.f32.mrb[89].mxu0  ;;  %v1576_v37 = vpop.f32.mrb[90].mxu1 }
 0x242   : > { %v2381_v36 = vadd.f32 %v3414_v63, %v1266_v35  ;;  %v1268_v38 = vpop.f32.mrb[90].mxu0  ;;  %2574 = vst [vmem:[%s3419_s8 + $0x430] sm:$0xff] %v2382_v33  ;;  %v2385_v39 = vadd.f32 %v3410_v61, %v1576_v37  ;;  %v1578_v41 = vpop.f32.mrb[91].mxu1 }
 0x243   : > { %2572 = vst [vmem:[%s3419_s8 + $0x420] sm:$0xff] %v2380_v0  ;;  %v2383_v40 = vadd.f32 %v3412_v62, %v1268_v38  ;;  %v1270_v42 = vpop.f32.mrb[91].mxu0 }
 0x244   : > { %2573 = vst [vmem:[%s3419_s8 + $0x428] sm:$0xff] %v2381_v36  ;;  %v2384_v43 = vadd.f32 %v3414_v63, %v1270_v42  ;;  %2577 = vst [vmem:[%s3419_s8 + $0x448] sm:$0xff] %v2385_v39 }
 0x245   : > { %2575 = vst [vmem:[%s3419_s8 + $0x438] sm:$0xff] %v2383_v40 }
 0x246   : > { %2576 = vst [vmem:[%s3419_s8 + $0x440] sm:$0xff] %v2384_v43 }
 0x247   : > { %v1581_v44 = vpop.f32.mrb[92].mxu1 }
 0x248   : > { %v1274_v45 = vpop.f32.mrb[92].mxu0  ;;  %v2388_v46 = vadd.f32 %v3410_v61, %v1581_v44  ;;  %v1583_v48 = vpop.f32.mrb[93].mxu1 }
 0x249   : > { %v2386_v47 = vadd.f32 %v3412_v62, %v1274_v45  ;;  %v1276_v49 = vpop.f32.mrb[93].mxu0  ;;  %v1584_v51 = vpop.f32.mrb[94].mxu1 }
 0x24a   : > { %v2387_v50 = vadd.f32 %v3414_v63, %v1276_v49  ;;  %v1278_v52 = vpop.f32.mrb[94].mxu0  ;;  %2580 = vst [vmem:[%s3419_s8 + $0x460] sm:$0xff] %v2388_v46  ;;  %v2391_v53 = vadd.f32 %v3410_v61, %v1584_v51  ;;  %v1586_v55 = vpop.f32.mrb[95].mxu1 }
 0x24b   : > { %2578 = vst [vmem:[%s3419_s8 + $0x450] sm:$0xff] %v2386_v47  ;;  %v2389_v54 = vadd.f32 %v3412_v62, %v1278_v52  ;;  %v1280_v56 = vpop.f32.mrb[95].mxu0 }
 0x24c   : > { %2579 = vst [vmem:[%s3419_s8 + $0x458] sm:$0xff] %v2387_v50  ;;  %v2390_v57 = vadd.f32 %v3414_v63, %v1280_v56  ;;  %2583 = vst [vmem:[%s3419_s8 + $0x478] sm:$0xff] %v2391_v53 }
 0x24d   : > { %2581 = vst [vmem:[%s3419_s8 + $0x468] sm:$0xff] %v2389_v54 }
 0x24e   : > { %2582 = vst [vmem:[%s3419_s8 + $0x470] sm:$0xff] %v2390_v57 }
 0x24f   : > { %v1589_v58 = vpop.f32.mrb[96].mxu1 }
 0x250   : > { %v1284_v59 = vpop.f32.mrb[96].mxu0  ;;  %v2394_v60 = vadd.f32 %v3410_v61, %v1589_v58  ;;  %v1591_v2 = vpop.f32.mrb[97].mxu1 }
 0x251   : > { %v2392_v1 = vadd.f32 %v3412_v62, %v1284_v59  ;;  %v1286_v3 = vpop.f32.mrb[97].mxu0  ;;  %v1592_v5 = vpop.f32.mrb[98].mxu1 }
 0x252   : > { %v2393_v4 = vadd.f32 %v3414_v63, %v1286_v3  ;;  %v1288_v6 = vpop.f32.mrb[98].mxu0  ;;  %2586 = vst [vmem:[%s3419_s8 + $0x490] sm:$0xff] %v2394_v60  ;;  %v2397_v7 = vadd.f32 %v3410_v61, %v1592_v5  ;;  %v1594_v9 = vpop.f32.mrb[99].mxu1 }
 0x253   : > { %2584 = vst [vmem:[%s3419_s8 + $0x480] sm:$0xff] %v2392_v1  ;;  %v2395_v8 = vadd.f32 %v3412_v62, %v1288_v6  ;;  %v1290_v10 = vpop.f32.mrb[99].mxu0 }
 0x254   : > { %2585 = vst [vmem:[%s3419_s8 + $0x488] sm:$0xff] %v2393_v4  ;;  %v2396_v11 = vadd.f32 %v3414_v63, %v1290_v10  ;;  %2589 = vst [vmem:[%s3419_s8 + $0x4a8] sm:$0xff] %v2397_v7 }
 0x255   : > { %2587 = vst [vmem:[%s3419_s8 + $0x498] sm:$0xff] %v2395_v8 }
 0x256   : > { %2588 = vst [vmem:[%s3419_s8 + $0x4a0] sm:$0xff] %v2396_v11 }
 0x257   : > { %v1597_v12 = vpop.f32.mrb[100].mxu1 }
 0x258   : > { %v1294_v13 = vpop.f32.mrb[100].mxu0  ;;  %v2400_v14 = vadd.f32 %v3410_v61, %v1597_v12  ;;  %v1599_v16 = vpop.f32.mrb[101].mxu1 }
 0x259   : > { %v2398_v15 = vadd.f32 %v3412_v62, %v1294_v13  ;;  %v1296_v17 = vpop.f32.mrb[101].mxu0  ;;  %v1600_v19 = vpop.f32.mrb[102].mxu1 }
 0x25a   : > { %v2399_v18 = vadd.f32 %v3414_v63, %v1296_v17  ;;  %v1298_v20 = vpop.f32.mrb[102].mxu0  ;;  %2592 = vst [vmem:[%s3419_s8 + $0x4c0] sm:$0xff] %v2400_v14  ;;  %v2403_v21 = vadd.f32 %v3410_v61, %v1600_v19  ;;  %v1602_v23 = vpop.f32.mrb[103].mxu1 }
 0x25b   : > { %2590 = vst [vmem:[%s3419_s8 + $0x4b0] sm:$0xff] %v2398_v15  ;;  %v2401_v22 = vadd.f32 %v3412_v62, %v1298_v20  ;;  %v1300_v24 = vpop.f32.mrb[103].mxu0 }
 0x25c   : > { %2591 = vst [vmem:[%s3419_s8 + $0x4b8] sm:$0xff] %v2399_v18  ;;  %v2402_v25 = vadd.f32 %v3414_v63, %v1300_v24  ;;  %2595 = vst [vmem:[%s3419_s8 + $0x4d8] sm:$0xff] %v2403_v21 }
 0x25d   : > { %2593 = vst [vmem:[%s3419_s8 + $0x4c8] sm:$0xff] %v2401_v22 }
 0x25e   : > { %2594 = vst [vmem:[%s3419_s8 + $0x4d0] sm:$0xff] %v2402_v25 }
 0x25f   : > { %v1605_v26 = vpop.f32.mrb[104].mxu1 }
 0x260   : > { %v1304_v27 = vpop.f32.mrb[104].mxu0  ;;  %v2406_v28 = vadd.f32 %v3410_v61, %v1605_v26  ;;  %v1607_v30 = vpop.f32.mrb[105].mxu1 }
 0x261   : > { %v2404_v29 = vadd.f32 %v3412_v62, %v1304_v27  ;;  %v1306_v31 = vpop.f32.mrb[105].mxu0  ;;  %v1608_v33 = vpop.f32.mrb[106].mxu1 }
 0x262   : > { %v2405_v32 = vadd.f32 %v3414_v63, %v1306_v31  ;;  %v1308_v0 = vpop.f32.mrb[106].mxu0  ;;  %2598 = vst [vmem:[%s3419_s8 + $0x4f0] sm:$0xff] %v2406_v28  ;;  %v2409_v34 = vadd.f32 %v3410_v61, %v1608_v33  ;;  %v1610_v36 = vpop.f32.mrb[107].mxu1 }
 0x263   : > { %2596 = vst [vmem:[%s3419_s8 + $0x4e0] sm:$0xff] %v2404_v29  ;;  %v2407_v35 = vadd.f32 %v3412_v62, %v1308_v0  ;;  %v1310_v37 = vpop.f32.mrb[107].mxu0 }
 0x264   : > { %2597 = vst [vmem:[%s3419_s8 + $0x4e8] sm:$0xff] %v2405_v32  ;;  %v2408_v38 = vadd.f32 %v3414_v63, %v1310_v37  ;;  %2601 = vst [vmem:[%s3419_s8 + $0x508] sm:$0xff] %v2409_v34 }
 0x265   : > { %2599 = vst [vmem:[%s3419_s8 + $0x4f8] sm:$0xff] %v2407_v35 }
 0x266   : > { %2600 = vst [vmem:[%s3419_s8 + $0x500] sm:$0xff] %v2408_v38 }
 0x267   : > { %v1613_v39 = vpop.f32.mrb[108].mxu1 }
 0x268   : > { %v1314_v40 = vpop.f32.mrb[108].mxu0  ;;  %v2412_v41 = vadd.f32 %v3410_v61, %v1613_v39  ;;  %v1615_v43 = vpop.f32.mrb[109].mxu1 }
 0x269   : > { %v2410_v42 = vadd.f32 %v3412_v62, %v1314_v40  ;;  %v1316_v44 = vpop.f32.mrb[109].mxu0  ;;  %v1616_v46 = vpop.f32.mrb[110].mxu1 }
 0x26a   : > { %v2411_v45 = vadd.f32 %v3414_v63, %v1316_v44  ;;  %v1318_v47 = vpop.f32.mrb[110].mxu0  ;;  %2604 = vst [vmem:[%s3419_s8 + $0x520] sm:$0xff] %v2412_v41  ;;  %v2415_v48 = vadd.f32 %v3410_v61, %v1616_v46  ;;  %v1618_v50 = vpop.f32.mrb[111].mxu1 }
 0x26b   : > { %2602 = vst [vmem:[%s3419_s8 + $0x510] sm:$0xff] %v2410_v42  ;;  %v2413_v49 = vadd.f32 %v3412_v62, %v1318_v47  ;;  %v1320_v51 = vpop.f32.mrb[111].mxu0 }
 0x26c   : > { %2603 = vst [vmem:[%s3419_s8 + $0x518] sm:$0xff] %v2411_v45  ;;  %v2414_v52 = vadd.f32 %v3414_v63, %v1320_v51  ;;  %2607 = vst [vmem:[%s3419_s8 + $0x538] sm:$0xff] %v2415_v48 }
 0x26d   : > { %2605 = vst [vmem:[%s3419_s8 + $0x528] sm:$0xff] %v2413_v49 }
 0x26e   : > { %2606 = vst [vmem:[%s3419_s8 + $0x530] sm:$0xff] %v2414_v52 }
 0x26f   : > { %v1621_v53 = vpop.f32.mrb[112].mxu1 }
 0x270   : > { %v1324_v54 = vpop.f32.mrb[112].mxu0  ;;  %v2418_v55 = vadd.f32 %v3410_v61, %v1621_v53  ;;  %v1623_v57 = vpop.f32.mrb[113].mxu1 }
 0x271   : > { %v2416_v56 = vadd.f32 %v3412_v62, %v1324_v54  ;;  %v1326_v58 = vpop.f32.mrb[113].mxu0  ;;  %v1624_v60 = vpop.f32.mrb[114].mxu1 }
 0x272   : > { %v2417_v59 = vadd.f32 %v3414_v63, %v1326_v58  ;;  %v1328_v1 = vpop.f32.mrb[114].mxu0  ;;  %2610 = vst [vmem:[%s3419_s8 + $0x550] sm:$0xff] %v2418_v55  ;;  %v2421_v2 = vadd.f32 %v3410_v61, %v1624_v60  ;;  %v1626_v4 = vpop.f32.mrb[115].mxu1 }
 0x273   : > { %2608 = vst [vmem:[%s3419_s8 + $0x540] sm:$0xff] %v2416_v56  ;;  %v2419_v3 = vadd.f32 %v3412_v62, %v1328_v1  ;;  %v1330_v5 = vpop.f32.mrb[115].mxu0 }
 0x274   : > { %2609 = vst [vmem:[%s3419_s8 + $0x548] sm:$0xff] %v2417_v59  ;;  %v2420_v6 = vadd.f32 %v3414_v63, %v1330_v5  ;;  %2613 = vst [vmem:[%s3419_s8 + $0x568] sm:$0xff] %v2421_v2 }
 0x275   : > { %2611 = vst [vmem:[%s3419_s8 + $0x558] sm:$0xff] %v2419_v3 }
 0x276   : > { %2612 = vst [vmem:[%s3419_s8 + $0x560] sm:$0xff] %v2420_v6 }
 0x277   : > { %v1629_v7 = vpop.f32.mrb[116].mxu1 }
 0x278   : > { %v1334_v8 = vpop.f32.mrb[116].mxu0  ;;  %v2424_v9 = vadd.f32 %v3410_v61, %v1629_v7  ;;  %v1631_v11 = vpop.f32.mrb[117].mxu1 }
 0x279   : > { %v2422_v10 = vadd.f32 %v3412_v62, %v1334_v8  ;;  %v1336_v12 = vpop.f32.mrb[117].mxu0  ;;  %v1632_v14 = vpop.f32.mrb[118].mxu1 }
 0x27a   : > { %v2423_v13 = vadd.f32 %v3414_v63, %v1336_v12  ;;  %v1338_v15 = vpop.f32.mrb[118].mxu0  ;;  %2616 = vst [vmem:[%s3419_s8 + $0x580] sm:$0xff] %v2424_v9  ;;  %v2427_v16 = vadd.f32 %v3410_v61, %v1632_v14  ;;  %v1634_v18 = vpop.f32.mrb[119].mxu1 }
 0x27b   : > { %2614 = vst [vmem:[%s3419_s8 + $0x570] sm:$0xff] %v2422_v10  ;;  %v2425_v17 = vadd.f32 %v3412_v62, %v1338_v15  ;;  %v1340_v19 = vpop.f32.mrb[119].mxu0 }
 0x27c   : > { %2615 = vst [vmem:[%s3419_s8 + $0x578] sm:$0xff] %v2423_v13  ;;  %v2426_v20 = vadd.f32 %v3414_v63, %v1340_v19  ;;  %2619 = vst [vmem:[%s3419_s8 + $0x598] sm:$0xff] %v2427_v16 }
 0x27d   : > { %2617 = vst [vmem:[%s3419_s8 + $0x588] sm:$0xff] %v2425_v17 }
 0x27e   : > { %2618 = vst [vmem:[%s3419_s8 + $0x590] sm:$0xff] %v2426_v20 }
 0x27f   : > { %v1637_v21 = vpop.f32.mrb[120].mxu1 }
 0x280   : > { %v1344_v22 = vpop.f32.mrb[120].mxu0  ;;  %v2430_v23 = vadd.f32 %v3410_v61, %v1637_v21  ;;  %v1639_v25 = vpop.f32.mrb[121].mxu1 }
 0x281   : > { %v2428_v24 = vadd.f32 %v3412_v62, %v1344_v22  ;;  %v1346_v26 = vpop.f32.mrb[121].mxu0  ;;  %v1640_v28 = vpop.f32.mrb[122].mxu1 }
 0x282   : > { %v2429_v27 = vadd.f32 %v3414_v63, %v1346_v26  ;;  %v1348_v29 = vpop.f32.mrb[122].mxu0  ;;  %2622 = vst [vmem:[%s3419_s8 + $0x5b0] sm:$0xff] %v2430_v23  ;;  %v2433_v30 = vadd.f32 %v3410_v61, %v1640_v28  ;;  %v1642_v32 = vpop.f32.mrb[123].mxu1 }
 0x283   : > { %2620 = vst [vmem:[%s3419_s8 + $0x5a0] sm:$0xff] %v2428_v24  ;;  %v2431_v31 = vadd.f32 %v3412_v62, %v1348_v29  ;;  %v1350_v33 = vpop.f32.mrb[123].mxu0 }
 0x284   : > { %2621 = vst [vmem:[%s3419_s8 + $0x5a8] sm:$0xff] %v2429_v27  ;;  %v2432_v0 = vadd.f32 %v3414_v63, %v1350_v33  ;;  %2625 = vst [vmem:[%s3419_s8 + $0x5c8] sm:$0xff] %v2433_v30 }
 0x285   : > { %2623 = vst [vmem:[%s3419_s8 + $0x5b8] sm:$0xff] %v2431_v31 }
 0x286   : > { %2624 = vst [vmem:[%s3419_s8 + $0x5c0] sm:$0xff] %v2432_v0 }
 0x287   : > { %v1645_v34 = vpop.f32.mrb[124].mxu1 }
 0x288   : > { %v1354_v35 = vpop.f32.mrb[124].mxu0  ;;  %v2436_v36 = vadd.f32 %v3410_v61, %v1645_v34  ;;  %v1647_v38 = vpop.f32.mrb[125].mxu1 }
 0x289   : > { %v2434_v37 = vadd.f32 %v3412_v62, %v1354_v35  ;;  %v1356_v39 = vpop.f32.mrb[125].mxu0  ;;  %v1648_v41 = vpop.f32.mrb[126].mxu1 }
 0x28a   : > { %v2435_v40 = vadd.f32 %v3414_v63, %v1356_v39  ;;  %v1358_v42 = vpop.f32.mrb[126].mxu0  ;;  %2628 = vst [vmem:[%s3419_s8 + $0x5e0] sm:$0xff] %v2436_v36  ;;  %v2439_v43 = vadd.f32 %v3410_v61, %v1648_v41  ;;  %v1650_v45 = vpop.f32.mrb[127].mxu1 }
 0x28b   : > { %2626 = vst [vmem:[%s3419_s8 + $0x5d0] sm:$0xff] %v2434_v37  ;;  %v2437_v44 = vadd.f32 %v3412_v62, %v1358_v42  ;;  %v1360_v46 = vpop.f32.mrb[127].mxu0 }
 0x28c   : > { %2627 = vst [vmem:[%s3419_s8 + $0x5d8] sm:$0xff] %v2435_v40  ;;  %v2438_v47 = vadd.f32 %v3414_v63, %v1360_v46  ;;  %2631 = vst [vmem:[%s3419_s8 + $0x5f8] sm:$0xff] %v2439_v43 }
 0x28d   : > { %2629 = vst [vmem:[%s3419_s8 + $0x5e8] sm:$0xff] %v2437_v44 }
 0x28e   : > { %2630 = vst [vmem:[%s3419_s8 + $0x5f0] sm:$0xff] %v2438_v47 }
 0x28f   : > { %2984 = shalt.err (!%p2981_p8)
}
 0x290   : > { %s2985_s18 = scalar_lea.hbm %s3798_s21, 24576  ;;  %s2989_s6 = scalar_lea.hbm %s3861_s3, 49152 }
 0x291   : > { %p2986_p10 = scmp.ne.s32.totalorder %s3798_s21, %s2985_s18  ;;  %p2990_p3 = scmp.lt.u32.totalorder %s3798_s21, %s3861_s3 }
 0x292   : > { %p2991_p2 = scmp.lt.u32.totalorder %s2989_s6, %s2985_s18  ;;  %p2993_p4 = scmp.lt.u32.totalorder %s2985_s18, %s3798_s21 }
 0x293   : > { %p2987_p13 = pnand %p2986_p10, %p3886_p6 }
 0x294   : > { %p2992_p11 = por %p2991_p2, %p2990_p3 }
 0x295   : > { %p2988_p7 = pneg %p2987_p13 }
 0x296   : > { %p2994_p1 = por %p2993_p4, %p2992_p11 }
 0x298   : > { %p2995_p12 = pnand %p2994_p1, %p2988_p7 }
 0x29a   : > { %2998 = shalt.err (!%p2995_p12)
}
 0x29b   : > { %s3069_s30 = smov 384   ;;  %s3070_s7 = smov 768  }
 0x29c   : > { %s3071_s8 = smov 24  }
 0x29d   : > { %2804 = dma.vmem_to_hbm [thread:$0]  (%p3886_p6), %s3804_s27, 24576, %s3798_s21, %s2633_s23, %s3069_s30, %s3070_s7, %s3071_s8  }
 0x29e PF: > { %s2664_s25 = sand.u32 1, %s3037_s12   ;;  %p3887_p0 = scmp.ne.s32.totalorder %s3876_s4, 0 }
 0x29f   : > { %p3888_p9 = scmp.ge.s32.totalorder %s3057_s17, 2  ;;  %s2665_s22 = scalar_lea.sflag [#allocation5], %s2664_s25 }
 0x2a1   : > { %p2818_p5 = pnand %p3888_p9, %p3887_p0 }
 0x2a3   : > { %3032 = dma.done.wait (!%p2818_p5), %s2665_s22, 24576  }
 0x2a4   : > { %3034 = vsyncadd (!%p2818_p5), %s2665_s22, 4294942720  ;;  %s20_s17 = sadd.s32 1, %s3057_s17   ;;  %s3889_s28 = sld [smem:[#allocation13_spill]] }
 0x2a5   : > { %p17_p8 = scmp.ge.s32.totalorder %s20_s17, 4   ;;  %s3890_s12 = smov %s3041_s13 }
 0x2a6   : > { %s3891_s13 = smov %s3045_s14  ;;  %s3892_s14 = smov %s3140_s24 }
 0x2a7   : > { %s3893_s15 = smov %s3053_s16  ;;  %19 = sbr.rel (!%p17_p8) target bundleno = 9 (0x9), region = 102 }
 0x2aa   : > { %s3894_s16 = smov %s3889_s28 }
 0x2ae   :  { %2670 = vsyncpa [#allocation4], 1 }
 0x2af   :  { %2672 = vsyncpa [#allocation4 + $0x1], 1 }
 0x2b0   :  { %2673 = vsyncpa [#allocation7], 1 }
 0x2b1   :  { %2675 = vsyncpa [#allocation7 + $0x1], 1 }
 0x2b2   :  { %2676 = vsyncpa [#allocation5], 1 }
 0x2b3   :  { %2678 = vsyncpa [#allocation5 + $0x1], 1 }

</bundles_post_ra>
